<compile_context>
chip_gen: v7x
topology: tpu7x:2x2x1
jax: 0.10.0
libtpu: 0.0.40
codegen_flags: <defaults>
</compile_context>

<pallas_src>
import numpy as np
import jax
import jax.numpy as jnp
from jax.experimental import pallas as pl
from jax.experimental.pallas import tpu as pltpu


def _round_up(x: int, m: int) -> int:
    return ((x + m - 1) // m) * m


# ---------------------------------------------------------------------------
# Fused kernel: all discriminators + all layers, grid = (batch, time_tile).
# ---------------------------------------------------------------------------
def _make_fused_kernel(tap_cfg, num_disc, hidden, cin4, tile, leaky, rows_per_disc):
    H, TT, RPD = hidden, tile, rows_per_disc

    def kernel(x4_ref, w_ref, b_ref, *out_refs):
        t = pl.program_id(1)
        col0 = pl.multiple_of(t * TT, 128)       # tile start (TT is a mult of 128)

        for d in range(num_disc):
            Q0, Q1, K2 = tap_cfg[d]
            W1 = TT + K2 - 1                     # y1 cols this tile (incl. halo)
            W0 = W1 + Q1 - 1                     # y0 cols this tile (incl. halo)
            WX = W0 + Q0 - 1                     # x4 cols read this tile
            doff = d * RPD

            # Packed parameter slabs (2 refs total) -> static in-kernel slices.
            ws = w_ref[doff:doff + RPD, :]       # (RPD, Wpad)
            bs = b_ref[doff:doff + RPD, :]       # (RPD, 1)
            w0 = ws[0:2 * H, 0:Q0 * cin4]
            w1 = ws[2 * H:3 * H, 0:Q1 * 2 * H]
            w2 = ws[3 * H:3 * H + 1, 0:K2 * H]
            b0 = bs[0:2 * H, :]
            b1 = bs[2 * H:3 * H, :]
            b2 = bs[3 * H:3 * H + 1, :]

            # Folded-input window for this tile (block is resident across t;
            # only the halo columns are re-read, never re-DMA'd).
            xw = x4_ref[0, :, pl.ds(col0, WX)]   # (cin4, WX)

            # -- layer 0: stride-2 conv on the 4-folded input, phase-split out.
            acc0 = jnp.zeros((2 * H, W0), jnp.float32)
            for q in range(Q0):                  # tap-accumulate (tiny contraction)
                acc0 = acc0 + jnp.dot(w0[:, q * cin4:(q + 1) * cin4],
                                      xw[:, q:q + W0],
                                      preferred_element_type=jnp.float32)
            y0 = acc0 + b0                       # (2H, 1) bias broadcast over lanes
            y0 = jnp.maximum(y0, leaky * y0)     # LeakyReLU: single VALU op
            f0_ref = out_refs[3 * d]
            f0_ref[0] = y0[:, :TT].astype(f0_ref.dtype)

            # -- layer 1: stride-2 conv == stride-1 conv on the phase-split y0.
            acc1 = jnp.zeros((H, W1), jnp.float32)
            for q in range(Q1):
                acc1 = acc1 + jnp.dot(w1[:, q * 2 * H:(q + 1) * 2 * H],
                                      y0[:, q:q + W1],
                                      preferred_element_type=jnp.float32)
            y1 = acc1 + b1
            y1 = jnp.maximum(y1, leaky * y1)
            f1_ref = out_refs[3 * d + 1]
            f1_ref[0] = y1[:, :TT].astype(f1_ref.dtype)

            # -- layer 2 (logits head): stride-1 conv, tap-accumulate.
            acc2 = jnp.zeros((1, TT), jnp.float32)
            for k in range(K2):
                acc2 = acc2 + jnp.dot(w2[:, k * H:(k + 1) * H],
                                      y1[:, k:k + TT],
                                      preferred_element_type=jnp.float32)
            lg = acc2 + b2
            lg_ref = out_refs[3 * d + 2]
            lg_ref[0] = lg.astype(lg_ref.dtype)

    return kernel


# ---------------------------------------------------------------------------
# MultiDiscriminator: N small conv-stack discriminators.
# forward(x) -> (List[logits], List[List[feature_map]])
# ---------------------------------------------------------------------------
class MultiDiscriminatorPallas:
    LEAKY = 0.1

    def __init__(self, in_channels=1, hidden=16, num_discriminators=2, seed=0,
                 out_dtype=jnp.float32, max_time_tile=512):
        # out_dtype:     jnp.float32 keeps exact PyTorch semantics (and suits
        #                v5e); jnp.bfloat16 halves HBM writeback on v6e/v7x.
        # max_time_tile: lane-tile upper bound (multiple of 128).  ~512-1024 on
        #                v5e/v6e; keep <= 512 on v7x (64 MiB VMEM).
        self._num = num_discriminators
        self.in_channels = in_channels
        self.hidden = hidden
        self.out_dtype = out_dtype
        self.max_time_tile = max(128, (max_time_tile // 128) * 128)
        self.cin4 = in_channels * 4

        key = jax.random.PRNGKey(seed)
        self.configs = []      # per-disc list of (Cin, Cout, K, stride, act)
        self.raw_params = []   # per-disc list of (w (K,Cin,Cout), b (Cout,))
        for d in range(num_discriminators):
            k0 = 5 + 2 * d     # different receptive field per discriminator scale
            layers = [
                (in_channels, hidden, k0, 2, True),
                (hidden, hidden, k0, 2, True),
                (hidden, 1, 3, 1, False),      # logits head
            ]
            self.configs.append(layers)
            lps = []
            for (ci, co, k, s, _act) in layers:
                key, kw, kb = jax.random.split(key, 3)
                w = jax.random.normal(kw, (k, ci, co), jnp.float32) * 0.1
                b = jax.random.normal(kb, (co,), jnp.float32) * 0.01
                lps.append((w, b))
            self.raw_params.append(lps)

        # Fold weights (stride removal) and pack everything into ONE weight
        # slab + ONE bias column (2 kernel args instead of 6 * num_disc).
        H = hidden
        self.rows_per_disc = _round_up(3 * H + 1, 8)
        self.tap_cfg = []
        folded = []
        wmax = 1
        for d in range(num_discriminators):
            pieces = self._fold_params(self.raw_params[d], H)
            w0_2d, _, w1_2d, _, w2_2d, _ = pieces
            Q0 = w0_2d.shape[1] // self.cin4
            Q1 = w1_2d.shape[1] // (2 * H)
            K2 = w2_2d.shape[1] // H
            self.tap_cfg.append((Q0, Q1, K2))
            folded.append(pieces)
            wmax = max(wmax, w0_2d.shape[1], w1_2d.shape[1], w2_2d.shape[1])
        wpad = _round_up(wmax, 128)
        RPD = self.rows_per_disc
        w_slab = np.zeros((num_discriminators * RPD, wpad), np.float32)
        b_slab = np.zeros((num_discriminators * RPD, 1), np.float32)
        for d, (w0_2d, b0_c, w1_2d, b1_c, w2_2d, b2_c) in enumerate(folded):
            off = d * RPD
            w_slab[off:off + 2 * H, :w0_2d.shape[1]] = w0_2d
            w_slab[off + 2 * H:off + 3 * H, :w1_2d.shape[1]] = w1_2d
            w_slab[off + 3 * H:off + 3 * H + 1, :w2_2d.shape[1]] = w2_2d
            b_slab[off:off + 2 * H, :] = b0_c
            b_slab[off + 2 * H:off + 3 * H, :] = b1_c
            b_slab[off + 3 * H:off + 3 * H + 1, :] = b2_c
        self.w_slab = jnp.asarray(w_slab)
        self.b_slab = jnp.asarray(b_slab)

    @property
    def num_discriminators(self) -> int:
        return self._num

    # -- weight folding (stride removal, done once, plain numpy) ------------
    @staticmethod
    def _fold_params(lps, H):
        (w0, b0), (w1, b1), (w2, b2) = lps
        K0, Cin, _ = w0.shape
        K1, K2 = w1.shape[0], w2.shape[0]
        Q0 = (K0 + 1) // 4 + 1   # layer-0 taps in the 4-folded input domain
        Q1 = (K1 - 1) // 2 + 1   # layer-1 taps over the phase-split input
        w0n, w1n, w2n = np.asarray(w0), np.asarray(w1), np.asarray(w2)
        b0n, b1n, b2n = np.asarray(b0), np.asarray(b1), np.asarray(b2)

        # layer 0: output position 2r+p1 reads input 4(r+q)+p4 with 4q+p4 = 2p1+k.
        W0f = np.zeros((Q0, Cin * 4, 2 * H), np.float32)
        for p1 in range(2):
            for k in range(K0):
                pos = 2 * p1 + k
                q, p4 = pos // 4, pos % 4
                W0f[q, np.arange(Cin) * 4 + p4, p1 * H:(p1 + 1) * H] = w0n[k]
        w0_2d = W0f.transpose(2, 0, 1).reshape(2 * H, Q0 * Cin * 4)
        b0_c = np.concatenate([b0n, b0n]).reshape(2 * H, 1)

        # layer 1: tap k1 -> (q1 = k1//2, phase p1 = k1%2) of the phase-split input.
        W1f = np.zeros((Q1, 2 * H, H), np.float32)
        for k1 in range(K1):
            q1, p1 = k1 // 2, k1 % 2
            W1f[q1, p1 * H:(p1 + 1) * H, :] = w1n[k1]
        w1_2d = W1f.transpose(2, 0, 1).reshape(H, Q1 * 2 * H)
        b1_c = b1n.reshape(H, 1)

        # layer 2: plain im2col weight.
        w2_2d = w2n.transpose(2, 0, 1).reshape(1, K2 * H)
        b2_c = b2n.reshape(1, 1)
        return (w0_2d, b0_c, w1_2d, b1_c, w2_2d, b2_c)

    # -- forward -------------------------------------------------------------
    def forward(self, x_ncl, out_dtype=None):
        """x_ncl: (B, C, L) as in PyTorch Conv1d. Returns (logits_list, fmaps_list)."""
        out_dtype = self.out_dtype if out_dtype is None else out_dtype
        x_ncl = jnp.asarray(x_ncl, jnp.float32)
        B, C, L = x_ncl.shape
        assert C == self.in_channels
        H = self.hidden
        cin4 = self.cin4
        RPD = self.rows_per_disc

        # Static per-discriminator geometry (valid-padding conv lengths).
        statics = []
        r1max, halo_max = 1, 0
        for d, layers in enumerate(self.configs):
            (_, _, K0, _, _), (_, _, K1, _, _), (_, _, K2, _, _) = layers
            L1 = (L - K0) // 2 + 1
            L2 = (L1 - K1) // 2 + 1
            L3 = L2 - K2 + 1
            assert L3 >= 1, "sequence too short for this discriminator"
            Q0, Q1, _ = self.tap_cfg[d]
            R1 = max(L2 + Q1 - 1, (L1 + 1) // 2)   # phase-split cols needed
            statics.append(dict(L1=L1, L2=L2, L3=L3))
            r1max = max(r1max, R1)
            halo_max = max(halo_max, (Q0 - 1) + (Q1 - 1) + (K2 - 1))

        # Time tiling: lane-dense tile (multiple of 128); halo recomputed per tile.
        TT = min(self.max_time_tile, _round_up(r1max, 128))
        n_tiles = pl.cdiv(r1max, TT)
        P = n_tiles * TT                            # padded output columns
        R_pad = _round_up(max(P + halo_max, pl.cdiv(L, 4)), 128)

        # Space-to-depth fold of the input by the total stride (4): every
        # in-kernel conv becomes stride-1 (no strided Ref reads).
        Lpad = 4 * R_pad
        xp = jnp.pad(x_ncl, ((0, 0), (0, 0), (0, Lpad - L)))
        x4 = xp.reshape(B, C, R_pad, 4).transpose(0, 1, 3, 2).reshape(B, cin4, R_pad)

        in_specs = [
            pl.BlockSpec((1, cin4, R_pad), lambda b, t: (b, 0, 0)),   # folded input
            pl.BlockSpec(self.w_slab.shape, lambda b, t: (0, 0)),     # weight slab
            pl.BlockSpec(self.b_slab.shape, lambda b, t: (0, 0)),     # bias column
        ]
        out_shapes, out_specs = [], []
        for _ in range(self._num):
            out_shapes += [
                jax.ShapeDtypeStruct((B, 2 * H, P), out_dtype),   # fmap0 (phase-split)
                jax.ShapeDtypeStruct((B, H, P), out_dtype),       # fmap1
                jax.ShapeDtypeStruct((B, 1, P), out_dtype),       # logits
            ]
            out_specs += [
                pl.BlockSpec((1, 2 * H, TT), lambda b, t: (b, 0, t)),
                pl.BlockSpec((1, H, TT), lambda b, t: (b, 0, t)),
                pl.BlockSpec((1, 1, TT), lambda b, t: (b, 0, t)),
            ]

        # VMEM budget: block buffers are double-buffered; add in-kernel
        # temporaries and headroom, cap at v7x-safe 64 MiB.
        osz = jnp.dtype(out_dtype).itemsize
        est = 2 * (max(cin4, 8) * R_pad * 4
                   + self.w_slab.size * 4 + self.b_slab.shape[0] * 128 * 4
                   + self._num * (2 * H + max(H, 8) + 8) * TT * osz)
        for (Q0, Q1, K2) in self.tap_cfg:
            w0w = TT + (K2 - 1) + (Q1 - 1)
            est += (2 * H * w0w + H * (TT + K2 - 1)
                    + max(cin4, 8) * (w0w + Q0 - 1)) * 8
        vmem_limit = int(min(64 * 2 ** 20, max(32 * 2 ** 20, est + (4 << 20))))

        kernel = _make_fused_kernel(self.tap_cfg, self._num, H, cin4, TT,
                                    self.LEAKY, RPD)
        # TODO(synk): for extreme sequence lengths also tile the folded input
        # (pl.Element halo window) instead of keeping the full (cin4, R_pad)
        # block resident per batch item.
        outs = pl.pallas_call(
            kernel,
            out_shape=tuple(out_shapes),
            grid_spec=pltpu.PrefetchScalarGridSpec(
                num_scalar_prefetch=0,
                grid=(B, n_tiles),
                in_specs=in_specs,
                out_specs=tuple(out_specs),
            ),
            compiler_params=pltpu.CompilerParams(
                dimension_semantics=("parallel", "parallel"),
                vmem_limit_bytes=vmem_limit),
        )(x4, self.w_slab, self.b_slab)

        # Un-fold the phase-split layer-0 feature maps back to NCL and trim the
        # lane padding (wrapper-side XLA layout plumbing).
        # TODO(synk): de-interleave fmap0 in-kernel (XLU shuffle) to avoid this
        # extra pass over the largest output.
        logits_list, fmaps_list = [], []
        for d, st in enumerate(statics):
            f0, f1, lg = outs[3 * d], outs[3 * d + 1], outs[3 * d + 2]
            fm0 = (f0.reshape(B, 2, H, P)
                     .transpose(0, 2, 3, 1)
                     .reshape(B, H, 2 * P)[:, :, :st["L1"]])
            fmaps_list.append([fm0, f1[:, :, :st["L2"]]])
            logits_list.append(lg[:, :, :st["L3"]])
        return logits_list, fmaps_list

    __call__ = forward


# ---------------------------------------------------------------------------
# Pure-JAX reference (lax conv, original un-folded weights) for sanity check.
# ---------------------------------------------------------------------------
def _ref_conv1d_ncl(x_ncl, w_kio, b, stride, leaky):
    y = jax.lax.conv_general_dilated(
        x_ncl, w_kio, window_strides=(stride,), padding="VALID",
        dimension_numbers=("NCW", "WIO", "NCW"))
    y = y + b[None, :, None]
    if leaky is not None:
        y = jnp.where(y >= 0, y, leaky * y)
    return y


if __name__ == "__main__":
    key = jax.random.PRNGKey(0)
    B, C, L = 2, 1, 1200
    x = jax.random.normal(key, (B, C, L), jnp.float32)

    # max_time_tile=128 forces a multi-tile grid even at this small L so the
    # halo stitching is exercised; raise towards 512-1024 for real audio.
    disc = MultiDiscriminatorPallas(in_channels=C, hidden=16,
                                    num_discriminators=2, seed=0,
                                    max_time_tile=128)
    logits_list, fmaps_list = disc(x)
    jax.block_until_ready(logits_list)
    jax.block_until_ready(fmaps_list)

    # f32 path against the lax reference (original weights / strides).
    for layers, lps, logits, fmaps in zip(disc.configs, disc.raw_params,
                                          logits_list, fmaps_list):
        h = x
        ref_fmaps = []
        for (ci, co, k, s, act), (w, b) in zip(layers, lps):
            h = _ref_conv1d_ncl(h, w, b, s, disc.LEAKY if act else None)
            if act:
                ref_fmaps.append(h)
        assert logits.shape == h.shape, (logits.shape, h.shape)
        assert jnp.allclose(logits, h, atol=1e-4, rtol=1e-4)
        for a, r in zip(fmaps, ref_fmaps):
            assert a.shape == r.shape, (a.shape, r.shape)
            assert jnp.allclose(a, r, atol=1e-4, rtol=1e-4)

    # bf16-output path (recommended on v6e/v7x: halves HBM writeback; math
    # stays f32 so it also lowers on v5e).
    lg_bf, fm_bf = disc(x, out_dtype=jnp.bfloat16)
    jax.block_until_ready(lg_bf)
    jax.block_until_ready(fm_bf)
    for a, r in zip(lg_bf, logits_list):
        assert a.shape == r.shape and a.dtype == jnp.bfloat16
        assert jnp.allclose(a.astype(jnp.float32), r, atol=3e-2, rtol=3e-2)

    assert len(logits_list) == disc.num_discriminators == 2
    assert len(fmaps_list) == disc.num_discriminators
    print("KERNEL_OK")
</pallas_src>

<mosaic_0001>
module attributes {stable_mosaic.version = 11 : i64} {
  func.func @kernel(%arg0: i32, %arg1: i32, %arg2: memref<1x4x512xf32, #tpu.memory_space<vmem>>, %arg3: memref<112x128xf32, #tpu.memory_space<vmem>>, %arg4: memref<112x1xf32, #tpu.memory_space<vmem>>, %arg5: memref<1x32x128xf32, #tpu.memory_space<vmem>>, %arg6: memref<1x16x128xf32, #tpu.memory_space<vmem>>, %arg7: memref<1x1x128xf32, #tpu.memory_space<vmem>>, %arg8: memref<1x32x128xf32, #tpu.memory_space<vmem>>, %arg9: memref<1x16x128xf32, #tpu.memory_space<vmem>>, %arg10: memref<1x1x128xf32, #tpu.memory_space<vmem>>) attributes {dimension_semantics = [#tpu.dimension_semantics<parallel>, #tpu.dimension_semantics<parallel>], iteration_bounds = array<i64: 2, 3>, scalar_prefetch = 0 : i64, scratch_operands = 0 : i64, tpu.core_type = #tpu.core_type<tc>, window_params = [{transform_indices = @transform_0, window_bounds = array<i64: 1, 4, 512>}, {pipeline_mode = #tpu.pipeline_mode<synchronous>, transform_indices = @transform_1, window_bounds = array<i64: 112, 128>}, {pipeline_mode = #tpu.pipeline_mode<synchronous>, transform_indices = @transform_2, window_bounds = array<i64: 112, 1>}, {transform_indices = @transform_3, window_bounds = array<i64: 1, 32, 128>}, {transform_indices = @transform_4, window_bounds = array<i64: 1, 16, 128>}, {transform_indices = @transform_5, window_bounds = array<i64: 1, 1, 128>}, {transform_indices = @transform_6, window_bounds = array<i64: 1, 32, 128>}, {transform_indices = @transform_7, window_bounds = array<i64: 1, 16, 128>}, {transform_indices = @transform_8, window_bounds = array<i64: 1, 1, 128>}]} {
    %c128_i32 = arith.constant 128 : i32
    %0 = arith.muli %arg1, %c128_i32 : i32
    %1 = tpu.assume_multiple %0, 128 : i32
    %c0 = arith.constant 0 : index
    %c0_0 = arith.constant 0 : index
    %2 = vector.load %arg3[%c0, %c0_0] : memref<112x128xf32, #tpu.memory_space<vmem>>, vector<56x128xf32>
    %c0_1 = arith.constant 0 : index
    %c0_2 = arith.constant 0 : index
    %3 = vector.load %arg4[%c0_1, %c0_2] : memref<112x1xf32, #tpu.memory_space<vmem>>, vector<56x1xf32>
    %4 = vector.extract_strided_slice %2 {offsets = [0, 0], sizes = [32, 8], strides = [1, 1]} : vector<56x128xf32> to vector<32x8xf32>
    %5 = vector.extract_strided_slice %2 {offsets = [32, 0], sizes = [16, 96], strides = [1, 1]} : vector<56x128xf32> to vector<16x96xf32>
    %6 = vector.extract_strided_slice %2 {offsets = [48, 0], sizes = [1, 48], strides = [1, 1]} : vector<56x128xf32> to vector<1x48xf32>
    %7 = vector.extract_strided_slice %3 {offsets = [0, 0], sizes = [32, 1], strides = [1, 1]} : vector<56x1xf32> to vector<32x1xf32>
    %8 = vector.extract_strided_slice %3 {offsets = [32, 0], sizes = [16, 1], strides = [1, 1]} : vector<56x1xf32> to vector<16x1xf32>
    %9 = vector.extract_strided_slice %3 {offsets = [48, 0], sizes = [1, 1], strides = [1, 1]} : vector<56x1xf32> to vector<1x1xf32>
    %c0_3 = arith.constant 0 : index
    %c0_4 = arith.constant 0 : index
    %10 = arith.index_cast %1 : i32 to index
    %11 = vector.load %arg2[%c0_3, %c0_4, %10] : memref<1x4x512xf32, #tpu.memory_space<vmem>>, vector<1x4x133xf32>
    %12 = vector.shape_cast %11 : vector<1x4x133xf32> to vector<4x133xf32>
    %cst = arith.constant 0.000000e+00 : f32
    %13 = vector.broadcast %cst : f32 to vector<32x132xf32>
    %14 = vector.extract_strided_slice %4 {offsets = [0, 0], sizes = [32, 4], strides = [1, 1]} : vector<32x8xf32> to vector<32x4xf32>
    %15 = vector.extract_strided_slice %12 {offsets = [0, 0], sizes = [4, 132], strides = [1, 1]} : vector<4x133xf32> to vector<4x132xf32>
    %cst_5 = arith.constant dense<0.000000e+00> : vector<32x132xf32>
    %16 = tpu.matmul %14, %15, %cst_5 {dimension_numbers = #tpu.dot_dimension_numbers<[1], [0], [0], [1], [0, 0, 1, 1], [], []>} : vector<32x4xf32>, vector<4x132xf32>, vector<32x132xf32> -> vector<32x132xf32>
    %17 = arith.addf %13, %16 : vector<32x132xf32>
    %18 = vector.extract_strided_slice %4 {offsets = [0, 4], sizes = [32, 4], strides = [1, 1]} : vector<32x8xf32> to vector<32x4xf32>
    %19 = vector.extract_strided_slice %12 {offsets = [0, 1], sizes = [4, 132], strides = [1, 1]} : vector<4x133xf32> to vector<4x132xf32>
    %cst_6 = arith.constant dense<0.000000e+00> : vector<32x132xf32>
    %20 = tpu.matmul %18, %19, %cst_6 {dimension_numbers = #tpu.dot_dimension_numbers<[1], [0], [0], [1], [0, 0, 1, 1], [], []>} : vector<32x4xf32>, vector<4x132xf32>, vector<32x132xf32> -> vector<32x132xf32>
    %21 = arith.addf %17, %20 : vector<32x132xf32>
    %22 = vector.broadcast %7 : vector<32x1xf32> to vector<32x132xf32>
    %23 = arith.addf %21, %22 : vector<32x132xf32>
    %cst_7 = arith.constant 1.000000e-01 : f32
    %24 = vector.broadcast %cst_7 : f32 to vector<32x132xf32>
    %25 = arith.mulf %24, %23 : vector<32x132xf32>
    %26 = arith.maximumf %23, %25 : vector<32x132xf32>
    %27 = vector.extract_strided_slice %26 {offsets = [0, 0], sizes = [32, 128], strides = [1, 1]} : vector<32x132xf32> to vector<32x128xf32>
    %c0_8 = arith.constant 0 : index
    %c0_9 = arith.constant 0 : index
    %c0_10 = arith.constant 0 : index
    %28 = vector.load %arg5[%c0_8, %c0_9, %c0_10] : memref<1x32x128xf32, #tpu.memory_space<vmem>>, vector<1x32x128xf32>
    %29 = vector.shape_cast %28 : vector<1x32x128xf32> to vector<32x128xf32>
    %30 = vector.shape_cast %27 : vector<32x128xf32> to vector<1x32x128xf32>
    tpu.vector_store %arg5[%c0_8, %c0_9, %c0_10], %30 {strides = array<i32>} : memref<1x32x128xf32, #tpu.memory_space<vmem>>, vector<1x32x128xf32>,
    %cst_11 = arith.constant 0.000000e+00 : f32
    %31 = vector.broadcast %cst_11 : f32 to vector<16x130xf32>
    %32 = vector.extract_strided_slice %5 {offsets = [0, 0], sizes = [16, 32], strides = [1, 1]} : vector<16x96xf32> to vector<16x32xf32>
    %33 = vector.extract_strided_slice %26 {offsets = [0, 0], sizes = [32, 130], strides = [1, 1]} : vector<32x132xf32> to vector<32x130xf32>
    %cst_12 = arith.constant dense<0.000000e+00> : vector<16x130xf32>
    %34 = tpu.matmul %32, %33, %cst_12 {dimension_numbers = #tpu.dot_dimension_numbers<[1], [0], [0], [1], [0, 0, 1, 1], [], []>} : vector<16x32xf32>, vector<32x130xf32>, vector<16x130xf32> -> vector<16x130xf32>
    %35 = arith.addf %31, %34 : vector<16x130xf32>
    %36 = vector.extract_strided_slice %5 {offsets = [0, 32], sizes = [16, 32], strides = [1, 1]} : vector<16x96xf32> to vector<16x32xf32>
    %37 = vector.extract_strided_slice %26 {offsets = [0, 1], sizes = [32, 130], strides = [1, 1]} : vector<32x132xf32> to vector<32x130xf32>
    %cst_13 = arith.constant dense<0.000000e+00> : vector<16x130xf32>
    %38 = tpu.matmul %36, %37, %cst_13 {dimension_numbers = #tpu.dot_dimension_numbers<[1], [0], [0], [1], [0, 0, 1, 1], [], []>} : vector<16x32xf32>, vector<32x130xf32>, vector<16x130xf32> -> vector<16x130xf32>
    %39 = arith.addf %35, %38 : vector<16x130xf32>
    %40 = vector.extract_strided_slice %5 {offsets = [0, 64], sizes = [16, 32], strides = [1, 1]} : vector<16x96xf32> to vector<16x32xf32>
    %41 = vector.extract_strided_slice %26 {offsets = [0, 2], sizes = [32, 130], strides = [1, 1]} : vector<32x132xf32> to vector<32x130xf32>
    %cst_14 = arith.constant dense<0.000000e+00> : vector<16x130xf32>
    %42 = tpu.matmul %40, %41, %cst_14 {dimension_numbers = #tpu.dot_dimension_numbers<[1], [0], [0], [1], [0, 0, 1, 1], [], []>} : vector<16x32xf32>, vector<32x130xf32>, vector<16x130xf32> -> vector<16x130xf32>
    %43 = arith.addf %39, %42 : vector<16x130xf32>
    %44 = vector.broadcast %8 : vector<16x1xf32> to vector<16x130xf32>
    %45 = arith.addf %43, %44 : vector<16x130xf32>
    %cst_15 = arith.constant 1.000000e-01 : f32
    %46 = vector.broadcast %cst_15 : f32 to vector<16x130xf32>
    %47 = arith.mulf %46, %45 : vector<16x130xf32>
    %48 = arith.maximumf %45, %47 : vector<16x130xf32>
    %49 = vector.extract_strided_slice %48 {offsets = [0, 0], sizes = [16, 128], strides = [1, 1]} : vector<16x130xf32> to vector<16x128xf32>
    %c0_16 = arith.constant 0 : index
    %c0_17 = arith.constant 0 : index
    %c0_18 = arith.constant 0 : index
    %50 = vector.load %arg6[%c0_16, %c0_17, %c0_18] : memref<1x16x128xf32, #tpu.memory_space<vmem>>, vector<1x16x128xf32>
    %51 = vector.shape_cast %50 : vector<1x16x128xf32> to vector<16x128xf32>
    %52 = vector.shape_cast %49 : vector<16x128xf32> to vector<1x16x128xf32>
    tpu.vector_store %arg6[%c0_16, %c0_17, %c0_18], %52 {strides = array<i32>} : memref<1x16x128xf32, #tpu.memory_space<vmem>>, vector<1x16x128xf32>,
    %cst_19 = arith.constant 0.000000e+00 : f32
    %53 = vector.broadcast %cst_19 : f32 to vector<1x128xf32>
    %54 = vector.extract_strided_slice %6 {offsets = [0, 0], sizes = [1, 16], strides = [1, 1]} : vector<1x48xf32> to vector<1x16xf32>
    %55 = vector.extract_strided_slice %48 {offsets = [0, 0], sizes = [16, 128], strides = [1, 1]} : vector<16x130xf32> to vector<16x128xf32>
    %cst_20 = arith.constant dense<0.000000e+00> : vector<1x128xf32>
    %56 = tpu.matmul %54, %55, %cst_20 {dimension_numbers = #tpu.dot_dimension_numbers<[1], [0], [0], [1], [0, 0, 1, 1], [], []>} : vector<1x16xf32>, vector<16x128xf32>, vector<1x128xf32> -> vector<1x128xf32>
    %57 = arith.addf %53, %56 : vector<1x128xf32>
    %58 = vector.extract_strided_slice %6 {offsets = [0, 16], sizes = [1, 16], strides = [1, 1]} : vector<1x48xf32> to vector<1x16xf32>
    %59 = vector.extract_strided_slice %48 {offsets = [0, 1], sizes = [16, 128], strides = [1, 1]} : vector<16x130xf32> to vector<16x128xf32>
    %cst_21 = arith.constant dense<0.000000e+00> : vector<1x128xf32>
    %60 = tpu.matmul %58, %59, %cst_21 {dimension_numbers = #tpu.dot_dimension_numbers<[1], [0], [0], [1], [0, 0, 1, 1], [], []>} : vector<1x16xf32>, vector<16x128xf32>, vector<1x128xf32> -> vector<1x128xf32>
    %61 = arith.addf %57, %60 : vector<1x128xf32>
    %62 = vector.extract_strided_slice %6 {offsets = [0, 32], sizes = [1, 16], strides = [1, 1]} : vector<1x48xf32> to vector<1x16xf32>
    %63 = vector.extract_strided_slice %48 {offsets = [0, 2], sizes = [16, 128], strides = [1, 1]} : vector<16x130xf32> to vector<16x128xf32>
    %cst_22 = arith.constant dense<0.000000e+00> : vector<1x128xf32>
    %64 = tpu.matmul %62, %63, %cst_22 {dimension_numbers = #tpu.dot_dimension_numbers<[1], [0], [0], [1], [0, 0, 1, 1], [], []>} : vector<1x16xf32>, vector<16x128xf32>, vector<1x128xf32> -> vector<1x128xf32>
    %65 = arith.addf %61, %64 : vector<1x128xf32>
    %66 = vector.broadcast %9 : vector<1x1xf32> to vector<1x128xf32>
    %67 = arith.addf %65, %66 : vector<1x128xf32>
    %c0_23 = arith.constant 0 : index
    %c0_24 = arith.constant 0 : index
    %c0_25 = arith.constant 0 : index
    %68 = vector.load %arg7[%c0_23, %c0_24, %c0_25] : memref<1x1x128xf32, #tpu.memory_space<vmem>>, vector<1x1x128xf32>
    %69 = vector.shape_cast %68 : vector<1x1x128xf32> to vector<1x128xf32>
    %70 = vector.shape_cast %67 : vector<1x128xf32> to vector<1x1x128xf32>
    tpu.vector_store %arg7[%c0_23, %c0_24, %c0_25], %70 {strides = array<i32>} : memref<1x1x128xf32, #tpu.memory_space<vmem>>, vector<1x1x128xf32>,
    %c56 = arith.constant 56 : index
    %c0_26 = arith.constant 0 : index
    %71 = vector.load %arg3[%c56, %c0_26] : memref<112x128xf32, #tpu.memory_space<vmem>>, vector<56x128xf32>
    %c56_27 = arith.constant 56 : index
    %c0_28 = arith.constant 0 : index
    %72 = vector.load %arg4[%c56_27, %c0_28] : memref<112x1xf32, #tpu.memory_space<vmem>>, vector<56x1xf32>
    %73 = vector.extract_strided_slice %71 {offsets = [0, 0], sizes = [32, 12], strides = [1, 1]} : vector<56x128xf32> to vector<32x12xf32>
    %74 = vector.extract_strided_slice %71 {offsets = [32, 0], sizes = [16, 128], strides = [1, 1]} : vector<56x128xf32> to vector<16x128xf32>
    %75 = vector.extract_strided_slice %71 {offsets = [48, 0], sizes = [1, 48], strides = [1, 1]} : vector<56x128xf32> to vector<1x48xf32>
    %76 = vector.extract_strided_slice %72 {offsets = [0, 0], sizes = [32, 1], strides = [1, 1]} : vector<56x1xf32> to vector<32x1xf32>
    %77 = vector.extract_strided_slice %72 {offsets = [32, 0], sizes = [16, 1], strides = [1, 1]} : vector<56x1xf32> to vector<16x1xf32>
    %78 = vector.extract_strided_slice %72 {offsets = [48, 0], sizes = [1, 1], strides = [1, 1]} : vector<56x1xf32> to vector<1x1xf32>
    %c0_29 = arith.constant 0 : index
    %c0_30 = arith.constant 0 : index
    %79 = arith.index_cast %1 : i32 to index
    %80 = vector.load %arg2[%c0_29, %c0_30, %79] : memref<1x4x512xf32, #tpu.memory_space<vmem>>, vector<1x4x135xf32>
    %81 = vector.shape_cast %80 : vector<1x4x135xf32> to vector<4x135xf32>
    %cst_31 = arith.constant 0.000000e+00 : f32
    %82 = vector.broadcast %cst_31 : f32 to vector<32x133xf32>
    %83 = vector.extract_strided_slice %73 {offsets = [0, 0], sizes = [32, 4], strides = [1, 1]} : vector<32x12xf32> to vector<32x4xf32>
    %84 = vector.extract_strided_slice %81 {offsets = [0, 0], sizes = [4, 133], strides = [1, 1]} : vector<4x135xf32> to vector<4x133xf32>
    %cst_32 = arith.constant dense<0.000000e+00> : vector<32x133xf32>
    %85 = tpu.matmul %83, %84, %cst_32 {dimension_numbers = #tpu.dot_dimension_numbers<[1], [0], [0], [1], [0, 0, 1, 1], [], []>} : vector<32x4xf32>, vector<4x133xf32>, vector<32x133xf32> -> vector<32x133xf32>
    %86 = arith.addf %82, %85 : vector<32x133xf32>
    %87 = vector.extract_strided_slice %73 {offsets = [0, 4], sizes = [32, 4], strides = [1, 1]} : vector<32x12xf32> to vector<32x4xf32>
    %88 = vector.extract_strided_slice %81 {offsets = [0, 1], sizes = [4, 133], strides = [1, 1]} : vector<4x135xf32> to vector<4x133xf32>
    %cst_33 = arith.constant dense<0.000000e+00> : vector<32x133xf32>
    %89 = tpu.matmul %87, %88, %cst_33 {dimension_numbers = #tpu.dot_dimension_numbers<[1], [0], [0], [1], [0, 0, 1, 1], [], []>} : vector<32x4xf32>, vector<4x133xf32>, vector<32x133xf32> -> vector<32x133xf32>
    %90 = arith.addf %86, %89 : vector<32x133xf32>
    %91 = vector.extract_strided_slice %73 {offsets = [0, 8], sizes = [32, 4], strides = [1, 1]} : vector<32x12xf32> to vector<32x4xf32>
    %92 = vector.extract_strided_slice %81 {offsets = [0, 2], sizes = [4, 133], strides = [1, 1]} : vector<4x135xf32> to vector<4x133xf32>
    %cst_34 = arith.constant dense<0.000000e+00> : vector<32x133xf32>
    %93 = tpu.matmul %91, %92, %cst_34 {dimension_numbers = #tpu.dot_dimension_numbers<[1], [0], [0], [1], [0, 0, 1, 1], [], []>} : vector<32x4xf32>, vector<4x133xf32>, vector<32x133xf32> -> vector<32x133xf32>
    %94 = arith.addf %90, %93 : vector<32x133xf32>
    %95 = vector.broadcast %76 : vector<32x1xf32> to vector<32x133xf32>
    %96 = arith.addf %94, %95 : vector<32x133xf32>
    %cst_35 = arith.constant 1.000000e-01 : f32
    %97 = vector.broadcast %cst_35 : f32 to vector<32x133xf32>
    %98 = arith.mulf %97, %96 : vector<32x133xf32>
    %99 = arith.maximumf %96, %98 : vector<32x133xf32>
    %100 = vector.extract_strided_slice %99 {offsets = [0, 0], sizes = [32, 128], strides = [1, 1]} : vector<32x133xf32> to vector<32x128xf32>
    %c0_36 = arith.constant 0 : index
    %c0_37 = arith.constant 0 : index
    %c0_38 = arith.constant 0 : index
    %101 = vector.load %arg8[%c0_36, %c0_37, %c0_38] : memref<1x32x128xf32, #tpu.memory_space<vmem>>, vector<1x32x128xf32>
    %102 = vector.shape_cast %101 : vector<1x32x128xf32> to vector<32x128xf32>
    %103 = vector.shape_cast %100 : vector<32x128xf32> to vector<1x32x128xf32>
    tpu.vector_store %arg8[%c0_36, %c0_37, %c0_38], %103 {strides = array<i32>} : memref<1x32x128xf32, #tpu.memory_space<vmem>>, vector<1x32x128xf32>,
    %cst_39 = arith.constant 0.000000e+00 : f32
    %104 = vector.broadcast %cst_39 : f32 to vector<16x130xf32>
    %105 = vector.extract_strided_slice %74 {offsets = [0, 0], sizes = [16, 32], strides = [1, 1]} : vector<16x128xf32> to vector<16x32xf32>
    %106 = vector.extract_strided_slice %99 {offsets = [0, 0], sizes = [32, 130], strides = [1, 1]} : vector<32x133xf32> to vector<32x130xf32>
    %cst_40 = arith.constant dense<0.000000e+00> : vector<16x130xf32>
    %107 = tpu.matmul %105, %106, %cst_40 {dimension_numbers = #tpu.dot_dimension_numbers<[1], [0], [0], [1], [0, 0, 1, 1], [], []>} : vector<16x32xf32>, vector<32x130xf32>, vector<16x130xf32> -> vector<16x130xf32>
    %108 = arith.addf %104, %107 : vector<16x130xf32>
    %109 = vector.extract_strided_slice %74 {offsets = [0, 32], sizes = [16, 32], strides = [1, 1]} : vector<16x128xf32> to vector<16x32xf32>
    %110 = vector.extract_strided_slice %99 {offsets = [0, 1], sizes = [32, 130], strides = [1, 1]} : vector<32x133xf32> to vector<32x130xf32>
    %cst_41 = arith.constant dense<0.000000e+00> : vector<16x130xf32>
    %111 = tpu.matmul %109, %110, %cst_41 {dimension_numbers = #tpu.dot_dimension_numbers<[1], [0], [0], [1], [0, 0, 1, 1], [], []>} : vector<16x32xf32>, vector<32x130xf32>, vector<16x130xf32> -> vector<16x130xf32>
    %112 = arith.addf %108, %111 : vector<16x130xf32>
    %113 = vector.extract_strided_slice %74 {offsets = [0, 64], sizes = [16, 32], strides = [1, 1]} : vector<16x128xf32> to vector<16x32xf32>
    %114 = vector.extract_strided_slice %99 {offsets = [0, 2], sizes = [32, 130], strides = [1, 1]} : vector<32x133xf32> to vector<32x130xf32>
    %cst_42 = arith.constant dense<0.000000e+00> : vector<16x130xf32>
    %115 = tpu.matmul %113, %114, %cst_42 {dimension_numbers = #tpu.dot_dimension_numbers<[1], [0], [0], [1], [0, 0, 1, 1], [], []>} : vector<16x32xf32>, vector<32x130xf32>, vector<16x130xf32> -> vector<16x130xf32>
    %116 = arith.addf %112, %115 : vector<16x130xf32>
    %117 = vector.extract_strided_slice %74 {offsets = [0, 96], sizes = [16, 32], strides = [1, 1]} : vector<16x128xf32> to vector<16x32xf32>
    %118 = vector.extract_strided_slice %99 {offsets = [0, 3], sizes = [32, 130], strides = [1, 1]} : vector<32x133xf32> to vector<32x130xf32>
    %cst_43 = arith.constant dense<0.000000e+00> : vector<16x130xf32>
    %119 = tpu.matmul %117, %118, %cst_43 {dimension_numbers = #tpu.dot_dimension_numbers<[1], [0], [0], [1], [0, 0, 1, 1], [], []>} : vector<16x32xf32>, vector<32x130xf32>, vector<16x130xf32> -> vector<16x130xf32>
    %120 = arith.addf %116, %119 : vector<16x130xf32>
    %121 = vector.broadcast %77 : vector<16x1xf32> to vector<16x130xf32>
    %122 = arith.addf %120, %121 : vector<16x130xf32>
    %cst_44 = arith.constant 1.000000e-01 : f32
    %123 = vector.broadcast %cst_44 : f32 to vector<16x130xf32>
    %124 = arith.mulf %123, %122 : vector<16x130xf32>
    %125 = arith.maximumf %122, %124 : vector<16x130xf32>
    %126 = vector.extract_strided_slice %125 {offsets = [0, 0], sizes = [16, 128], strides = [1, 1]} : vector<16x130xf32> to vector<16x128xf32>
    %c0_45 = arith.constant 0 : index
    %c0_46 = arith.constant 0 : index
    %c0_47 = arith.constant 0 : index
    %127 = vector.load %arg9[%c0_45, %c0_46, %c0_47] : memref<1x16x128xf32, #tpu.memory_space<vmem>>, vector<1x16x128xf32>
    %128 = vector.shape_cast %127 : vector<1x16x128xf32> to vector<16x128xf32>
    %129 = vector.shape_cast %126 : vector<16x128xf32> to vector<1x16x128xf32>
    tpu.vector_store %arg9[%c0_45, %c0_46, %c0_47], %129 {strides = array<i32>} : memref<1x16x128xf32, #tpu.memory_space<vmem>>, vector<1x16x128xf32>,
    %cst_48 = arith.constant 0.000000e+00 : f32
    %130 = vector.broadcast %cst_48 : f32 to vector<1x128xf32>
    %131 = vector.extract_strided_slice %75 {offsets = [0, 0], sizes = [1, 16], strides = [1, 1]} : vector<1x48xf32> to vector<1x16xf32>
    %132 = vector.extract_strided_slice %125 {offsets = [0, 0], sizes = [16, 128], strides = [1, 1]} : vector<16x130xf32> to vector<16x128xf32>
    %cst_49 = arith.constant dense<0.000000e+00> : vector<1x128xf32>
    %133 = tpu.matmul %131, %132, %cst_49 {dimension_numbers = #tpu.dot_dimension_numbers<[1], [0], [0], [1], [0, 0, 1, 1], [], []>} : vector<1x16xf32>, vector<16x128xf32>, vector<1x128xf32> -> vector<1x128xf32>
    %134 = arith.addf %130, %133 : vector<1x128xf32>
    %135 = vector.extract_strided_slice %75 {offsets = [0, 16], sizes = [1, 16], strides = [1, 1]} : vector<1x48xf32> to vector<1x16xf32>
    %136 = vector.extract_strided_slice %125 {offsets = [0, 1], sizes = [16, 128], strides = [1, 1]} : vector<16x130xf32> to vector<16x128xf32>
    %cst_50 = arith.constant dense<0.000000e+00> : vector<1x128xf32>
    %137 = tpu.matmul %135, %136, %cst_50 {dimension_numbers = #tpu.dot_dimension_numbers<[1], [0], [0], [1], [0, 0, 1, 1], [], []>} : vector<1x16xf32>, vector<16x128xf32>, vector<1x128xf32> -> vector<1x128xf32>
    %138 = arith.addf %134, %137 : vector<1x128xf32>
    %139 = vector.extract_strided_slice %75 {offsets = [0, 32], sizes = [1, 16], strides = [1, 1]} : vector<1x48xf32> to vector<1x16xf32>
    %140 = vector.extract_strided_slice %125 {offsets = [0, 2], sizes = [16, 128], strides = [1, 1]} : vector<16x130xf32> to vector<16x128xf32>
    %cst_51 = arith.constant dense<0.000000e+00> : vector<1x128xf32>
    %141 = tpu.matmul %139, %140, %cst_51 {dimension_numbers = #tpu.dot_dimension_numbers<[1], [0], [0], [1], [0, 0, 1, 1], [], []>} : vector<1x16xf32>, vector<16x128xf32>, vector<1x128xf32> -> vector<1x128xf32>
    %142 = arith.addf %138, %141 : vector<1x128xf32>
    %143 = vector.broadcast %78 : vector<1x1xf32> to vector<1x128xf32>
    %144 = arith.addf %142, %143 : vector<1x128xf32>
    %c0_52 = arith.constant 0 : index
    %c0_53 = arith.constant 0 : index
    %c0_54 = arith.constant 0 : index
    %145 = vector.load %arg10[%c0_52, %c0_53, %c0_54] : memref<1x1x128xf32, #tpu.memory_space<vmem>>, vector<1x1x128xf32>
    %146 = vector.shape_cast %145 : vector<1x1x128xf32> to vector<1x128xf32>
    %147 = vector.shape_cast %144 : vector<1x128xf32> to vector<1x1x128xf32>
    tpu.vector_store %arg10[%c0_52, %c0_53, %c0_54], %147 {strides = array<i32>} : memref<1x1x128xf32, #tpu.memory_space<vmem>>, vector<1x1x128xf32>,
    return
  }
  func.func @transform_0(%arg0: i32, %arg1: i32) -> (i32, i32, i32) {
    %c0_i32 = arith.constant 0 : i32
    %c0_i32_0 = arith.constant 0 : i32
    %c0_i32_1 = arith.constant 0 : i32
    return %arg0, %c0_i32, %c0_i32_0 : i32, i32, i32
  }
  func.func @transform_1(%arg0: i32, %arg1: i32) -> (i32, i32) {
    %c0_i32 = arith.constant 0 : i32
    %c0_i32_0 = arith.constant 0 : i32
    %c0_i32_1 = arith.constant 0 : i32
    return %c0_i32, %c0_i32_0 : i32, i32
  }
  func.func @transform_2(%arg0: i32, %arg1: i32) -> (i32, i32) {
    %c0_i32 = arith.constant 0 : i32
    %c0_i32_0 = arith.constant 0 : i32
    %c0_i32_1 = arith.constant 0 : i32
    return %c0_i32, %c0_i32_0 : i32, i32
  }
  func.func @transform_3(%arg0: i32, %arg1: i32) -> (i32, i32, i32) {
    %c0_i32 = arith.constant 0 : i32
    %c0_i32_0 = arith.constant 0 : i32
    return %arg0, %c0_i32, %arg1 : i32, i32, i32
  }
  func.func @transform_4(%arg0: i32, %arg1: i32) -> (i32, i32, i32) {
    %c0_i32 = arith.constant 0 : i32
    %c0_i32_0 = arith.constant 0 : i32
    return %arg0, %c0_i32, %arg1 : i32, i32, i32
  }
  func.func @transform_5(%arg0: i32, %arg1: i32) -> (i32, i32, i32) {
    %c0_i32 = arith.constant 0 : i32
    %c0_i32_0 = arith.constant 0 : i32
    return %arg0, %c0_i32, %arg1 : i32, i32, i32
  }
  func.func @transform_6(%arg0: i32, %arg1: i32) -> (i32, i32, i32) {
    %c0_i32 = arith.constant 0 : i32
    %c0_i32_0 = arith.constant 0 : i32
    return %arg0, %c0_i32, %arg1 : i32, i32, i32
  }
  func.func @transform_7(%arg0: i32, %arg1: i32) -> (i32, i32, i32) {
    %c0_i32 = arith.constant 0 : i32
    %c0_i32_0 = arith.constant 0 : i32
    return %arg0, %c0_i32, %arg1 : i32, i32, i32
  }
  func.func @transform_8(%arg0: i32, %arg1: i32) -> (i32, i32, i32) {
    %c0_i32 = arith.constant 0 : i32
    %c0_i32_0 = arith.constant 0 : i32
    return %arg0, %c0_i32, %arg1 : i32, i32, i32
  }
}

</mosaic_0001>

<bundles_post_ra>
// kernel: tpu_custom_call.1
= control target key start
LH: loop header
LB: loop body
LE: loop exit
PB: predicated region body
PF: predicated region fallthrough
CT: control target
= control target key end

     0   :  { %s4585_s0 = inlined_call_operand.hbm [shape: f32[2,4,512], index: 0, kind: input, shape index: {}]   ;;  %s4586_s1 = inlined_call_operand.vmem [shape: f32[112,128], index: 1, kind: input, shape index: {}]   ;;  %s4587_s2 = inlined_call_operand.vmem [shape: f32[112,1], index: 2, kind: input, shape index: {}]   ;;  %s4588_s3 = inlined_call_operand.hbm [shape: f32[2,32,384], index: 3, kind: output, shape index: {0}]   ;;  %s4589_s4 = inlined_call_operand.hbm [shape: f32[2,16,384], index: 4, kind: output, shape index: {1}]   ;;  %s4590_s5 = inlined_call_operand.hbm [shape: f32[2,1,384], index: 5, kind: output, shape index: {2}]   ;;  %s4591_s6 = inlined_call_operand.hbm [shape: f32[2,32,384], index: 6, kind: output, shape index: {3}]   ;;  %s4592_s7 = inlined_call_operand.hbm [shape: f32[2,16,384], index: 7, kind: output, shape index: {4}]   ;;  %s4593_s8 = inlined_call_operand.hbm [shape: f32[2,1,384], index: 8, kind: output, shape index: {5}]  }
   0x1   :  { %4620 = sst [smem:[#allocation30_spill]] %s4585_s0 }
   0x2   :  { %4621 = sst [smem:[#allocation31_spill]] %s4586_s1 }
   0x3   :  { %4622 = sst [smem:[#allocation32_spill]] %s4587_s2 }
   0x4   :  { %4623 = sst [smem:[#allocation33_spill]] %s4589_s4 }
   0x5   :  { %4624 = sst [smem:[#allocation34_spill]] %s4590_s5 }
   0x6   :  { %4625 = sst [smem:[#allocation35_spill]] %s4592_s7 }
   0x7   :  { %4626 = sst [smem:[#allocation36_spill]] %s4593_s8 }
   0x8   :  { %14 = vsyncpa [#allocation3], 0 }
   0x9   :  { %16 = vsyncpa [#allocation3 + $0x1], 0 }
   0xa   :  { %17 = vsyncpa [#allocation4], 0 }
   0xb   :  { %19 = vsyncpa [#allocation4 + $0x1], 0 }
   0xc   :  { %20 = vsyncpa [#allocation7], 0 }
   0xd   :  { %22 = vsyncpa [#allocation7 + $0x1], 0 }
   0xe   :  { %23 = vsyncpa [#allocation10], 0 }
   0xf   :  { %25 = vsyncpa [#allocation10 + $0x1], 0 }
  0x10   :  { %26 = vsyncpa [#allocation13], 0 }
  0x11   :  { %28 = vsyncpa [#allocation13 + $0x1], 0  ;;  %s3697_s27 = smov 0   ;;  %s3699_s28 = smov 0  }
  0x12   :  { %s3701_s29 = smov 0   ;;  %s3703_s30 = smov 0  }
  0x13   :  { %s3705_s9 = smov 0   ;;  %s3707_s10 = smov 0  }
  0x14   :  { %s3709_s11 = smov 0   ;;  %s3711_s12 = smov 0  }
  0x15   :  { %s3713_s13 = smov 0   ;;  %s3715_s14 = smov 0  }
  0x16   :  { %s3717_s15 = smov 0  }
  0x17 LB: > { %4627 = sst [smem:[#allocation19_spill]] %s3591_s28  ;;  %s3751_s16 = sadd.s32 4294967295, %s3627_s15   ;;  %s3627_s15 = sphi %s3717_s15, %s34_s15   ;;  %s3623_s14 = sphi %s3715_s14, %s4677_s14   ;;  %s3619_s13 = sphi %s3713_s13, %s4676_s13   ;;  %s3615_s12 = sphi %s3711_s12, %s4675_s12   ;;  %s3611_s11 = sphi %s3709_s11, %s4674_s11   ;;  %s3607_s10 = sphi %s3707_s10, %s4673_s10   ;;  %s3603_s9 = sphi %s3705_s9, %s4672_s9   ;;  %s3599_s30 = sphi %s3703_s30, %s4671_s30   ;;  %s3595_s29 = sphi %s3701_s29, %s4670_s29   ;;  %s3591_s28 = sphi %s3699_s28, %s4669_s28   ;;  %s3587_s27 = sphi %s3697_s27, %s4668_s27  }
  0x18   : > { %4628 = sst [smem:[#allocation20_spill]] %s3595_s29  ;;  %s43_s18 = sadd.s32 1, %s3619_s13 }
  0x19   : > { %4629 = sst [smem:[#allocation21_spill]] %s3603_s9  ;;  %s46_s19 = sadd.s32 1, %s3623_s14 }
  0x1a   : > { %4630 = sst [smem:[#allocation22_spill]] %s3607_s10  ;;  %p44_p0 = scmp.ge.s32.totalorder %s43_s18, 3 }
  0x1b   : > { %4631 = sst [smem:[#allocation23_spill]] %s3619_s13  ;;  %s53_s20 = sadd.s32 1, %s3607_s10 }
  0x1c   : > { %4632 = sst [smem:[#allocation24_spill]] %s3623_s14  ;;  %p60_p1 = scmp.ne.s32.totalorder %s3607_s10, %s3603_s9 }
  0x1d   : > { %p61_p2 = scmp.eq.s32.totalorder %s3627_s15, 0  ;;  %s4679_s18 = smov (%p44_p0, %s43_s18), 0 }
  0x1e   : > { %4633 = sst [smem:[#allocation25_spill]] %s4679_s18  ;;  %s4681_s19 = smov (!%p44_p0, %s46_s19), %s3623_s14 }
  0x1f   : > { %p3763_p3 = por %p61_p2, %p60_p1  ;;  %p66_p4 = scmp.ne.s32.totalorder %s3603_s9, %s3599_s30 }
  0x20   : > { %p48_p5 = scmp.ge.s32.totalorder %s4681_s19, 2  ;;  %p67_p6 = scmp.eq.s32.totalorder %s3751_s16, 0 }
  0x21   : > { %s119_s22 = ssub.s32 %s3619_s13, %s4679_s18  ;;  %s123_s23 = sadd.s32 1, %s3595_s29 }
  0x22   : > { %s4683_s19 = smov (%p48_p5, %s4681_s19), 0  ;;  %p3774_p7 = por %p67_p6, %p66_p4 }
  0x23   : > { %4635 = sst [smem:[#allocation26_spill]] %s4683_s19  ;;  %p133_p8 = scmp.ne.s32.totalorder %s3595_s29, %s3591_s28 }
  0x24   : > { %s50_s25 = ssub.s32 %s3623_s14, %s4683_s19  ;;  %p134_p9 = scmp.eq.s32.totalorder %s3751_s16, 5 }
  0x25   : > { %p51_p10 = scmp.eq.s32.totalorder %s50_s25, 0  ;;  %s120_s26 = sor.u32 %s119_s22, %s50_s25 }
  0x26   : > { %p121_p11 = scmp.eq.s32.totalorder %s120_s26, 0  ;;  %p3783_p12 = por %p134_p9, %p133_p8 }
  0x27   : > { %s3788_s17 = scalar_select %p51_p10, %s3607_s10, %s53_s20  }
  0x28   : > { %s4637_s30 = scalar_select %p3783_p12, 1, 0 }
  0x29   : > { %4638 = sst [smem:[#allocation27_spill]] %s3788_s17  ;;  %p139_p13 = scmp.ne.s32.totalorder %s3591_s28, %s3587_s27 }
  0x2a   : > { %s3791_s18 = scalar_select %p121_p11, %s3595_s29, %s123_s23  }
  0x2b   : > { %s4640_s13 = sadd.s32 4294967294, %s3627_s15   ;;  %p3074_p1 = scmp.lt.s32.totalorder %s3627_s15, 6 }
  0x2c   : > { %4639 = sst [smem:[#allocation28_spill]] %s3791_s18  ;;  %p140_p0 = scmp.eq.s32.totalorder %s4640_s13, 5 }
  0x2d   : > { %s306_s22 = sand.u32 1, %s3607_s10   ;;  %s2852_s26 = sshll.u32 %s3623_s14, 8 }
  0x2e   : > { %p3798_p2 = por %p140_p0, %p139_p13  ;;  %s2779_s25 = sshll.u32 %s306_s22, 4 }
  0x2f   : > { %s4643_s0 = sld [smem:[#allocation30_spill]]  ;;  %s310_s20 = scalar_lea.vmem [#allocation2], %s2779_s25 }
  0x30   : > { %s4641_s19 = scalar_select %p3798_p2, 1, 0 }
  0x31   : > { %s318_s23 = sshll.u32 %s310_s20, 4  ;;  %p3813_p4 = pnand %p3074_p1, %p3763_p3  ;;  %s3809_s23 = int_to_ptr.vmem [resolvable:$true] %s318_s23 }
  0x32   : > { %4642 = sst [smem:[#allocation29_spill]] %s4641_s19  ;;  %s307_s5 = scalar_lea.sflag [#allocation3], %s306_s22 }
  0x33   : > { %p3325_p9 = pneg %p3813_p4 }
  0x35   : > { %s3807_s7 = scalar_lea.hbm %s4643_s0, %s2852_s26  ;;  %s3328_s21 = scalar_lea.hbm %s4643_s0, 512 }
  0x36   : > { %s3323_s8 = scalar_lea.hbm %s3807_s7, 256  ;;  %p3329_p3 = scmp.lt.u32.totalorder %s3807_s7, %s4643_s0 }
  0x37   : > { %p3324_p8 = scmp.ne.s32.totalorder %s3807_s7, %s3323_s8  ;;  %p3330_p13 = scmp.lt.u32.totalorder %s3328_s21, %s3323_s8 }
  0x38   : > { %p3332_p1 = scmp.lt.u32.totalorder %s3323_s8, %s3807_s7 }
  0x39   : > { %p3326_p10 = pnand %p3325_p9, %p3324_p8  ;;  %p3331_p0 = por %p3330_p13, %p3329_p3 }
  0x3b   : > { %p3327_p11 = pneg %p3326_p10  ;;  %p3333_p5 = por %p3332_p1, %p3331_p0 }
  0x3d   : > { %p3334_p6 = pnand %p3333_p5, %p3327_p11 }
  0x3f   : > { %3337 = shalt.err (!%p3334_p6)
}
  0x40   : > { %s3338_s22 = scalar_lea.vmem %s3809_s23, 256  ;;  %s3629_s25 = smov [#allocation2]  }
  0x41   : > { %p3339_p8 = scmp.ne.s32.totalorder %s3809_s23, %s3338_s22  ;;  %s3343_s26 = sshll.u32 %s3629_s25, 4  ;;  %s3344_s26 = int_to_ptr.vmem [resolvable:$false] %s3343_s26 }
  0x42   : > { %s3345_s14 = scalar_lea.vmem %s3344_s26, 512  ;;  %p3346_p12 = scmp.lt.s32.totalorder %s3809_s23, %s3344_s26 }
  0x43   : > { %p3341_p10 = pnand %p3339_p8, %p3325_p9  ;;  %p3347_p3 = scmp.lt.s32.totalorder %s3345_s14, %s3338_s22 }
  0x45   : > { %p3342_p2 = pneg %p3341_p10  ;;  %p3348_p13 = por %p3347_p3, %p3346_p12 }
  0x47   : > { %p3349_p0 = pnand %p3348_p13, %p3342_p2 }
  0x49   : > { %3352 = shalt.err (!%p3349_p0)
}
  0x4a   : > { %3054 = dma.hbm_to_vmem [thread:$0]  (!%p3813_p4), %s3807_s7, 256, %s3809_s23, %s307_s5  }
  0x4b   : > { %p4645_p5 = scmp.lt.s32.totalorder %s3627_s15, 7  ;;  %p4646_p6 = scmp.ge.s32.totalorder %s3627_s15, 1 }
  0x4d   : > { %p324_p9 = pnand %p4646_p6, %p4645_p5 }
  0x4e   : > { %s329_s8 = sand.u32 (!%p324_p9), 1, %s3603_s9  }
  0x4f   : > { %327 = sbr.rel (%p324_p9) target bundleno = 1830 (0x726), region = 32  ;;  %s2783_s21 = sshll.u32 (!%p324_p9), %s329_s8, 4 }
  0x50   : > { %s330_s20 = scalar_lea.sflag (!%p324_p9), [#allocation3], %s329_s8  ;;  %s333_s22 = scalar_lea.vmem (!%p324_p9), [#allocation2], %s2783_s21 }
  0x56   : > { %3566 = dma.done.wait (%p3774_p7), %s330_s20, 256  }
  0x57   : > { %3568 = vsyncadd (%p3774_p7), %s330_s20, 4294967040  ;;  %s2788_s13 = sshll.u32 %s3611_s11, 7  ;;  %v3630_v0 = vmov 0.0   ;;  %s4647_s1 = sld [smem:[#allocation31_spill]]  ;;  %v3633_v9 = vmov 0   ;;  %vm438_vm0 = vcmask 1043456  }
  0x58   : > { %s404_s25 = sshra.s32 %s2788_s13, 7  ;;  %507 = vmatprep.mubr.f32.mxu0 %v3630_v0  ;;  %792 = vmatprep.mubr.f32.mxu1 %v3630_v0  ;;  %s4610_s14 = smov 127   ;;  %vm427_vm1 = vcmask 1039360   ;;  %vm429_vm2 = vcmask 31744   ;;  %vm723_vm3 = vcmask 261120   ;;  %vm906_vm4 = vcmask 1031168  }
  0x59   : > { %s2789_s7 = sshll.u32 %s404_s25, 2  ;;  %s3632_s24 = smov 124   ;;  %3180 = vset.pattern.permute.xlu0 %v3633_v9  ;;  %3181 = vset.pattern.permute.xlu1 %v3633_v9  ;;  %vm3640_vm5 = vmmov 0   ;;  %vm1047_vm6 = vcmask 130048   ;;  %vm2033_vm7 = vcmask 1022976  }
  0x5a   : > { %s407_s23 = scalar_lea.vmem %s333_s22, %s2789_s7 [#allocation2]  ;;  %s4648_s2 = sld [smem:[#allocation32_spill]] }
  0x5b   : > { %v3856_v1 = vld [vmem:[%s407_s23] sm:$0xff]  ;;  %s3917_s13 = sand.u32 1, %s3591_s28   ;;  %s4603_s26 = smov 96  }
  0x5c   : > { %423 = vrot.lane.b32.xlu0 %v3856_v1, %s4610_s14  ;;  %v3865_v3 = vcombine.high %v3856_v1, %v3856_v1  ;;  %s4602_s25 = sshll.u32 %s3917_s13, 5  ;;  %s4607_s20 = smov 126  }
  0x5d   : > { %v390_v2 = vld [vmem:[%s4647_s1] sm:$0xff]  ;;  %v391_v4 = vld [vmem:[%s4647_s1 + $0x8] sm:$0xff]  ;;  %v392_v5 = vld [vmem:[%s4647_s1 + $0x10] sm:$0xff]  ;;  %s3926_s7 = scalar_lea.vmem [#allocation5], %s4602_s25  ;;  %s4605_s22 = smov 64  }
  0x5e   : > { %413 = vrot.lane.b32.xlu1 %v390_v2, %s3632_s24  ;;  %v393_v6 = vld [vmem:[%s4647_s1 + $0x18] sm:$0xff]  ;;  %v3964_v60 = vld [vmem:[%s4647_s1 + $0x20] sm:$0xff]  ;;  %v4024_v9 = vld [vmem:[%s4647_s1 + $0x50] sm:$0xff]  ;;  %s3637_s23 = smov 120   ;;  %s4649_s5 = smov 96  }
  0x5f   : > { %s4612_s8 = sshll.u32 %s3917_s13, 4  ;;  %s4650_s21 = smov 126  }
  0x60   : > { %425 = vrot.lane.b32.xlu0 %v3865_v3, %s4610_s14  ;;  %v397_v7 = vld [vmem:[%s4648_s2] sm:$0xff]  ;;  %v398_v8 = vld [vmem:[%s4648_s2 + $0x8] sm:$0xff]  ;;  %v399_v10 = vld [vmem:[%s4648_s2 + $0x10] sm:$0xff]  ;;  %s4651_s25 = sshll.u32 %s3917_s13, 5  ;;  %s4653_s0 = sshll.u32 %s3917_s13, 4 }
  0x61   : > { %v400_v11 = vld [vmem:[%s4648_s2 + $0x18] sm:$0xff]  ;;  %s368_s17 = scalar_lea.vmem [#allocation8], %s3917_s13  ;;  %s4656_s4 = sld [smem:[#allocation33_spill]] }
  0x62   : > { %415 = vrot.lane.b32.xlu1 %v391_v4, %s3632_s24  ;;  %p4657_p12 = scmp.ne.s32.totalorder %s4637_s30, 0 }
  0x64   : > { %417 = vrot.lane.b32.xlu0 %v392_v5, %s3632_s24 }
  0x66   : > { %419 = vrot.lane.b32.xlu1 %v393_v6, %s3632_s24 }
  0x68   : > { %635 = vperm.xlu0 %3180, %v397_v7   ;;  %v4010_v7 = vld [vmem:[%s4647_s1 + $0x40] sm:$0xff] }
  0x6a   : > { %640 = vperm.xlu1 %3181, %v398_v8   ;;  %v4015_v8 = vld [vmem:[%s4647_s1 + $0x48] sm:$0xff] }
  0x6c   : > { %650 = vperm.xlu0 %3180, %v400_v11   ;;  %v1294_v11 = vld [vmem:[%s4648_s2 + $0x40] sm:$0xff] }
  0x6e   : > { %645 = vperm.xlu1 %3181, %v399_v10   ;;  %v1293_v10 = vld [vmem:[%s4648_s2 + $0x38] sm:$0xff] }
  0xce   : > { %v424_v12 = vpop.permute.xlu0 %423 }
  0xd0   : > { %v414_v13 = vpop.permute.xlu1 %413 }
  0xd2   : > { %v426_v14 = vpop.permute.xlu0 %425 }
  0xd3   : > { %2790 = vmatprep.subr.msk.mxu0 %vm438_vm0, %v426_v14  ;;  %v428_v15 = vsel %vm427_vm1, %v424_v12, %v426_v14  ;;  %v1295_v12 = vld [vmem:[%s4648_s2 + $0x48] sm:$0xff] }
  0xd4   : > { %2791 = vmatpush1.msk.msra.mxu0 %vm438_vm0, %v428_v15  ;;  %v416_v16 = vpop.permute.xlu1 %415 }
  0xd5   : > { %2792 = vmatmul.mubr.msk.f32.vlgmr.msra.gmra.mrb[0].mxu0 %vm429_vm2, %v414_v13  ;;  %2796 = vmatprep.subr.msk.mxu0 %vm438_vm0, %v3865_v3  ;;  %v1296_v13 = vld [vmem:[%s4648_s2 + $0x50] sm:$0xff] }
  0xd6   : > { %513 = vmatprep.mubr.f32.mxu0 %v3630_v0  ;;  %2797 = vmatpush1.msk.msra.mxu0 %vm438_vm0, %v3856_v1  ;;  %v418_v17 = vpop.permute.xlu0 %417 }
  0xd8   : > { %v420_v18 = vpop.permute.xlu1 %419 }
  0xd9   : > { %2793 = vmatmul.mubr.msk.f32.gmra.mrb[2].mxu0 %vm429_vm2, %v416_v16 }
  0xda   : > { %519 = vmatprep.mubr.f32.mxu0 %v3630_v0 }
  0xdd   : > { %2794 = vmatmul.mubr.msk.f32.gmra.mrb[4].mxu0 %vm429_vm2, %v418_v17 }
  0xde   : > { %525 = vmatprep.mubr.f32.mxu0 %v3630_v0 }
  0xe1   : > { %2795 = vmatmul.mubr.msk.f32.gmra.mrb[6].mxu0 %vm429_vm2, %v420_v18 }
  0xe2   : > { %608 = vmatprep.mubr.f32.mxu0 %v3630_v0 }
  0xe5   : > { %2798 = vmatmul.mubr.msk.f32.vlgmr.msra.gmra.mrb[0].mxu0 %vm429_vm2, %v390_v2  ;;  %v3978_v2 = vld [vmem:[%s4647_s1 + $0x28] sm:$0xff] }
  0xe6   : > { %614 = vmatprep.mubr.f32.mxu0 %v3630_v0 }
  0xe7   : > { %v636_v19 = vpop.permute.xlu0 %635 }
  0xe9   : > { %2799 = vmatmul.mubr.msk.f32.gmra.mrb[2].mxu0 %vm429_vm2, %v391_v4  ;;  %v641_v21 = vpop.permute.xlu1 %640  ;;  %v401_v4 = vld [vmem:[%s4648_s2 + $0x20] sm:$0xff] }
  0xea   : > { %620 = vmatprep.mubr.f32.mxu0 %v3630_v0 }
  0xeb   : > { %v651_v45 = vpop.permute.xlu0 %650 }
  0xed   : > { %2800 = vmatmul.mubr.msk.f32.gmra.mrb[4].mxu0 %vm429_vm2, %v392_v5  ;;  %v646_v33 = vpop.permute.xlu1 %645  ;;  %v402_v5 = vld [vmem:[%s4648_s2 + $0x28] sm:$0xff] }
  0xee   : > { %626 = vmatprep.mubr.f32.mxu0 %v3630_v0 }
  0xf1   : > { %2801 = vmatmul.mubr.msk.f32.gmra.mrb[6].mxu0 %vm429_vm2, %v393_v6  ;;  %v4001_v6 = vld [vmem:[%s4647_s1 + $0x38] sm:$0xff] }
  0xf2   : > { %2882 = vmatprep.mubr.msk.f32.mxu0 %vm3640_vm5, %v3630_v0 }
 0x1b8   : > { %v610_v20 = vpop.f32.mrb[0].mxu0 }
 0x1b9   : > { %v653_v22 = vadd.f32 %v636_v19, %v610_v20  ;;  %v612_v23 = vpop.f32.mrb[1].mxu0 }
 0x1ba   : > { %v654_v24 = vadd.f32 %v636_v19, %v612_v23 }
 0x1bb   : > { %v661_v25 = vmul.f32 0.1, %v653_v22 }
 0x1bc   : > { %v662_v26 = vmul.f32 0.1, %v654_v24  ;;  %v616_v27 = vpop.f32.mrb[2].mxu0 }
 0x1bd   : > { %v3920_v28 = vmax.f32 %v653_v22, %v661_v25  ;;  %v655_v29 = vadd.f32 %v641_v21, %v616_v27  ;;  %v618_v30 = vpop.f32.mrb[3].mxu0 }
 0x1be   : > { %v3922_v31 = vmax.f32 %v654_v24, %v662_v26  ;;  %v656_v32 = vadd.f32 %v641_v21, %v618_v30 }
 0x1bf   : > { %677 = vst [vmem:[%s3926_s7] sm:$0xff] %v3920_v28  ;;  %v663_v34 = vmul.f32 0.1, %v655_v29 }
 0x1c0   : > { %v664_v35 = vmul.f32 0.1, %v656_v32  ;;  %v622_v36 = vpop.f32.mrb[4].mxu0  ;;  %v3182_v37 = vpack.i.bf16 %v3922_v31, %v3920_v28 }
 0x1c1   : > { %v3932_v38 = vmax.f32 %v655_v29, %v663_v34  ;;  %v657_v39 = vadd.f32 %v646_v33, %v622_v36  ;;  %v624_v40 = vpop.f32.mrb[5].mxu0 }
 0x1c2   : > { %v3934_v41 = vmax.f32 %v656_v32, %v664_v35  ;;  %v658_v42 = vadd.f32 %v646_v33, %v624_v40  ;;  %3183 = vrot.lane.b32.xlu1 %v3182_v37, %s4610_s14 }
 0x1c3   : > { %678 = vst [vmem:[%s3926_s7 + $0x8] sm:$0xff] %v3932_v38  ;;  %v665_v43 = vmul.f32 0.1, %v657_v39  ;;  %v2923_v44 = vpack.c.bf16 %v3932_v38, %v3920_v28 }
 0x1c4   : > { %v666_v46 = vmul.f32 0.1, %v658_v42  ;;  %v628_v47 = vpop.f32.mrb[6].mxu0  ;;  %v3187_v48 = vpack.i.bf16 %v3934_v41, %v3932_v38  ;;  %v2921_v52 = vpack.c.bf16 %v3934_v41, %v3922_v31 }
 0x1c5   : > { %v3943_v49 = vmax.f32 %v657_v39, %v665_v43  ;;  %v659_v50 = vadd.f32 %v651_v45, %v628_v47  ;;  %v630_v51 = vpop.f32.mrb[7].mxu0 }
 0x1c6   : > { %v3947_v53 = vmax.f32 %v658_v42, %v666_v46  ;;  %v660_v54 = vadd.f32 %v651_v45, %v630_v51  ;;  %3188 = vrot.lane.b32.xlu0 %v3187_v48, %s4610_s14 }
 0x1c7   : > { %679 = vst [vmem:[%s3926_s7 + $0x10] sm:$0xff] %v3943_v49  ;;  %v667_v55 = vmul.f32 0.1, %v659_v50 }
 0x1c8   : > { %v668_v56 = vmul.f32 0.1, %v660_v54  ;;  %v3192_v57 = vpack.i.bf16 %v3947_v53, %v3943_v49 }
 0x1c9   : > { %v3954_v58 = vmax.f32 %v659_v50, %v667_v55 }
 0x1ca   : > { %v3956_v59 = vmax.f32 %v660_v54, %v668_v56  ;;  %3193 = vrot.lane.b32.xlu1 %v3192_v57, %s4610_s14 }
 0x1cb   : > { %680 = vst [vmem:[%s3926_s7 + $0x18] sm:$0xff] %v3954_v58  ;;  %v2927_v61 = vpack.c.bf16 %v3954_v58, %v3943_v49 }
 0x1cc   : > { %v3197_v62 = vpack.i.bf16 %v3956_v59, %v3954_v58  ;;  %v2925_v63 = vpack.c.bf16 %v3956_v59, %v3947_v53  ;;  %v396_v58 = vld [vmem:[%s4647_s1 + $0x30] sm:$0xff]  ;;  %v3639_v59 = vmov 0.0|0.0  }
 0x1cd   : > { %2940 = vmatprep.subr.bf16.mxu0 %v3639_v59 }
 0x1ce   : > { %3198 = vrot.lane.b32.xlu0 %v3197_v62, %s4610_s14  ;;  %683 = vrot.lane.b32.xlu1 %v3964_v60, %s4603_s26 }
 0x1d2   : > { %685 = vrot.lane.b32.xlu0 %v3978_v2, %s4603_s26  ;;  %3203 = vrot.lane.b32.xlu1 %v3182_v37, %s4607_s20  ;;  %s4162_s26 = scalar_lea.vmem [#allocation9], %s4651_s25  ;;  %s3031_s25 = smul.u32 12, %s3615_s12 }
 0x1d6   : > { %3208 = vrot.lane.b32.xlu0 %v3187_v48, %s4607_s20  ;;  %3213 = vrot.lane.b32.xlu1 %v3192_v57, %s4607_s20 }
 0x1da   : > { %3218 = vrot.lane.b32.xlu0 %v3197_v62, %s4607_s20  ;;  %886 = vrot.lane.b32.xlu1 %v3964_v60, %s4605_s22 }
 0x1de   : > { %888 = vrot.lane.b32.xlu0 %v3978_v2, %s4605_s22  ;;  %1006 = vperm.xlu1 %3181, %v401_v4   ;;  %s4652_s22 = smov 64  }
 0x1e2   : > { %1011 = vperm.xlu0 %3180, %v402_v5   ;;  %1315 = vrot.lane.b32.xlu1 %v3856_v1, %s4610_s14 }
 0x1e6   : > { %1317 = vrot.lane.b32.xlu0 %v3865_v3, %s4610_s14  ;;  %1305 = vrot.lane.b32.xlu1 %v4001_v6, %s3632_s24 }
 0x1ea   : > { %1307 = vrot.lane.b32.xlu0 %v4010_v7, %s3632_s24  ;;  %1309 = vrot.lane.b32.xlu1 %v4015_v8, %s3632_s24 }
 0x1ee   : > { %1311 = vrot.lane.b32.xlu0 %v4024_v9, %s3632_s24  ;;  %1530 = vrot.lane.b32.xlu1 %v3856_v1, %s4607_s20  ;;  %s4095_s24 = scalar_lea.vmem [#allocation6], %s4612_s8  ;;  %s4654_s8 = smov 127  }
 0x1f2   : > { %1532 = vrot.lane.b32.xlu0 %v3865_v3, %s4607_s20  ;;  %1522 = vrot.lane.b32.xlu1 %v4001_v6, %s3637_s23  ;;  %s3641_s20 = smov 125  }
 0x1f6   : > { %1524 = vrot.lane.b32.xlu0 %v4010_v7, %s3637_s23  ;;  %1526 = vrot.lane.b32.xlu1 %v4015_v8, %s3637_s23 }
 0x1fa   : > { %1528 = vrot.lane.b32.xlu0 %v4024_v9, %s3637_s23  ;;  %1646 = vperm.xlu1 %3181, %v1293_v10   ;;  %s4609_s23 = smov 112  }
 0x1fe   : > { %1651 = vperm.xlu0 %3180, %v1294_v11   ;;  %1656 = vperm.xlu1 %3181, %v1295_v12  }
 0x202   : > { %1661 = vperm.xlu0 %3180, %v1296_v13   ;;  %1029 = vrot.lane.b32.xlu1 %v396_v58, %s4609_s23  ;;  %s3642_s23 = smov 32  }
 0x206   : > { %1192 = vrot.lane.b32.xlu0 %v396_v58, %s4649_s5 }
 0x234   : > { %v3184_v14 = vpop.permute.xlu1 %3183 }
 0x235   : > { %v3186_v15 = vunpack.i.h.bf16 %v3184_v14  ;;  %v3185_v16 = vunpack.i.l.bf16 %v3184_v14 }
 0x237   : > { %v711_v21 = vsel %vm427_vm1, %v3185_v16, %v3186_v15 }
 0x238   : > { %v3189_v17 = vpop.permute.xlu0 %3188 }
 0x239   : > { %v3191_v18 = vunpack.i.h.bf16 %v3189_v17  ;;  %v3190_v19 = vunpack.i.l.bf16 %v3189_v17 }
 0x23b   : > { %v2913_v20 = vpack.c.bf16 %v3191_v18, %v3186_v15  ;;  %v712_v22 = vsel %vm427_vm1, %v3190_v19, %v3191_v18 }
 0x23c   : > { %v3194_v23 = vpop.permute.xlu1 %3193  ;;  %v2915_v24 = vpack.c.bf16 %v712_v22, %v711_v21 }
 0x23d   : > { %2914 = vmatprep.subr.bf16.mxu1 %v2913_v20  ;;  %v3196_v25 = vunpack.i.h.bf16 %v3194_v23  ;;  %v3195_v26 = vunpack.i.l.bf16 %v3194_v23 }
 0x23e   : > { %2916 = vmatpush1.bf16.msra.mxu1 %v2915_v24 }
 0x23f   : > { %v713_v34 = vsel %vm427_vm1, %v3195_v26, %v3196_v25 }
 0x240   : > { %v3199_v27 = vpop.permute.xlu0 %3198  ;;  %v684_v29 = vpop.permute.xlu1 %683 }
 0x241   : > { %v3201_v30 = vunpack.i.h.bf16 %v3199_v27  ;;  %v3200_v32 = vunpack.i.l.bf16 %v3199_v27 }
 0x243   : > { %v2917_v33 = vpack.c.bf16 %v3201_v30, %v3196_v25  ;;  %v714_v35 = vsel %vm427_vm1, %v3200_v32, %v3201_v30 }
 0x244   : > { %v686_v36 = vpop.permute.xlu0 %685  ;;  %v2919_v37 = vpack.c.bf16 %v714_v35, %v713_v34  ;;  %v3204_v39 = vpop.permute.xlu1 %3203 }
 0x245   : > { %2918 = vmatprep.subr.bf16.mxu1 %v2917_v33  ;;  %v3206_v45 = vunpack.i.h.bf16 %v3204_v39  ;;  %v3205_v46 = vunpack.i.l.bf16 %v3204_v39 }
 0x246   : > { %2920 = vmatpush1.bf16.msra.mxu1 %v2919_v37 }
 0x247   : > { %2922 = vmatprep.subr.bf16.mxu1 %v2921_v52  ;;  %v907_v28 = vsel %vm906_vm4, %v3205_v46, %v3206_v45 }
 0x248   : > { %v3209_v40 = vpop.permute.xlu0 %3208  ;;  %v3214_v31 = vpop.permute.xlu1 %3213 }
 0x249   : > { %v3211_v42 = vunpack.i.h.bf16 %v3209_v40  ;;  %v3210_v43 = vunpack.i.l.bf16 %v3209_v40  ;;  %2802 = vmatmul.mubr.msk.f32.vlgmr.msra.gmra.mrb[0].mxu1 %vm723_vm3, %v684_v29  ;;  %v3216_v38 = vunpack.i.h.bf16 %v3214_v31 }
 0x24a   : > { %2924 = vmatpush1.bf16.msra.mxu1 %v2923_v44  ;;  %798 = vmatprep.mubr.f32.mxu1 %v3630_v0  ;;  %v3215_v44 = vunpack.i.l.bf16 %v3214_v31 }
 0x24b   : > { %2926 = vmatprep.subr.bf16.mxu1 %v2925_v63  ;;  %v908_v47 = vsel %vm906_vm4, %v3210_v43, %v3211_v42  ;;  %v2929_v48 = vpack.c.bf16 %v3211_v42, %v3206_v45 }
 0x24c   : > { %v3219_v41 = vpop.permute.xlu0 %3218  ;;  %v2931_v52 = vpack.c.bf16 %v908_v47, %v907_v28  ;;  %v909_v49 = vsel %vm906_vm4, %v3215_v44, %v3216_v38  ;;  %v887_v56 = vpop.permute.xlu1 %886 }
 0x24d   : > { %v3221_v50 = vunpack.i.h.bf16 %v3219_v41  ;;  %v3220_v51 = vunpack.i.l.bf16 %v3219_v41  ;;  %2803 = vmatmul.mubr.msk.f32.gmra.mrb[2].mxu1 %vm723_vm3, %v686_v36 }
 0x24e   : > { %2928 = vmatpush1.bf16.msra.mxu1 %v2927_v61  ;;  %873 = vmatprep.mubr.f32.mxu1 %v3630_v0 }
 0x24f   : > { %2930 = vmatprep.subr.bf16.mxu1 %v2929_v48  ;;  %v910_v53 = vsel %vm906_vm4, %v3220_v51, %v3221_v50  ;;  %v2933_v54 = vpack.c.bf16 %v3221_v50, %v3216_v38 }
 0x250   : > { %v2935_v55 = vpack.c.bf16 %v910_v53, %v909_v49  ;;  %v889_v57 = vpop.permute.xlu0 %888 }
 0x251   : > { %2804 = vmatmul.mubr.msk.f32.vlgmr.msra.gmra.mrb[0].mxu1 %vm723_vm3, %v3964_v60 }
 0x252   : > { %2932 = vmatpush1.bf16.msra.mxu1 %v2931_v52  ;;  %879 = vmatprep.mubr.f32.mxu1 %v3630_v0 }
 0x253   : > { %2934 = vmatprep.subr.bf16.mxu1 %v2933_v54 }
 0x255   : > { %2805 = vmatmul.mubr.msk.f32.gmra.mrb[2].mxu1 %vm723_vm3, %v3978_v2 }
 0x256   : > { %2936 = vmatpush1.bf16.msra.mxu1 %v2935_v55  ;;  %987 = vmatprep.mubr.f32.mxu1 %v3630_v0 }
 0x257   : > { %2937 = vmatprep.subr.bf16.mxu1 %v3639_v59 }
 0x259   : > { %2806 = vmatmul.mubr.msk.f32.vlgmr.msra.gmra.mrb[0].mxu1 %vm723_vm3, %v887_v56 }
 0x25a   : > { %993 = vmatprep.mubr.f32.mxu1 %v3630_v0 }
 0x25d   : > { %2807 = vmatmul.mubr.msk.f32.gmra.mrb[2].mxu1 %vm723_vm3, %v889_v57  ;;  %v1007_v61 = vpop.permute.xlu1 %1006 }
 0x25e   : > { %2875 = vmatprep.mubr.msk.f32.mxu1 %vm3640_vm5, %v3630_v0 }
 0x261   : > { %v1012_v60 = vpop.permute.xlu0 %1011  ;;  %v1316_v26 = vpop.permute.xlu1 %1315 }
 0x265   : > { %v1318_v5 = vpop.permute.xlu0 %1317  ;;  %v1306_v30 = vpop.permute.xlu1 %1305 }
 0x266   : > { %v1319_v27 = vsel %vm427_vm1, %v1316_v26, %v1318_v5 }
 0x269   : > { %v1308_v21 = vpop.permute.xlu0 %1307  ;;  %v1310_v33 = vpop.permute.xlu1 %1309 }
 0x26d   : > { %v1312_v29 = vpop.permute.xlu0 %1311 }
 0x271   : > { %v1533_v32 = vpop.permute.xlu0 %1532 }
 0x32c   : > { %v989_v62 = vpop.f32.mrb[0].mxu1 }
 0x32d   : > { %v1014_v63 = vadd.f32 %v1007_v61, %v989_v62  ;;  %v991_v2 = vpop.f32.mrb[1].mxu1 }
 0x32e   : > { %v1015_v4 = vadd.f32 %v1007_v61, %v991_v2 }
 0x32f   : > { %v1018_v10 = vmul.f32 0.1, %v1014_v63 }
 0x330   : > { %v1019_v11 = vmul.f32 0.1, %v1015_v4  ;;  %v995_v12 = vpop.f32.mrb[2].mxu1 }
 0x331   : > { %v1022_v13 = vmax.f32 %v1014_v63, %v1018_v10  ;;  %v1016_v14 = vadd.f32 %v1012_v60, %v995_v12  ;;  %v997_v15 = vpop.f32.mrb[3].mxu1 }
 0x332   : > { %v1023_v16 = vmax.f32 %v1015_v4, %v1019_v11  ;;  %v1017_v17 = vadd.f32 %v1012_v60, %v997_v15 }
 0x333   : > { %1026 = vst [vmem:[%s4095_s24] sm:$0xff] %v1022_v13  ;;  %v1020_v18 = vmul.f32 0.1, %v1016_v14 }
 0x334   : > { %v1021_v19 = vmul.f32 0.1, %v1017_v17  ;;  %v3222_v20 = vpack.i.bf16 %v1023_v16, %v1022_v13 }
 0x335   : > { %v1024_v22 = vmax.f32 %v1016_v14, %v1020_v18 }
 0x336   : > { %v1025_v23 = vmax.f32 %v1017_v17, %v1021_v19  ;;  %3223 = vrot.lane.b32.xlu1 %v3222_v20, %s4610_s14 }
 0x337   : > { %1027 = vst [vmem:[%s4095_s24 + $0x8] sm:$0xff] %v1024_v22  ;;  %v2941_v24 = vpack.c.bf16 %v1024_v22, %v1022_v13 }
 0x338   : > { %v3232_v25 = vpack.i.bf16 %v1025_v23, %v1024_v22 }
 0x339   : > { %2942 = vmatpush3.bf16.msra.mxu0 %v2941_v24 }
 0x33a   : > { %3228 = vrot.lane.b32.xlu1 %v3222_v20, %s4650_s21  ;;  %3233 = vrot.lane.b32.xlu0 %v3232_v25, %s4610_s14 }
 0x33b   : > { %2811 = vmatprep.subr.msk.mxu0 %vm438_vm0, %v1318_v5 }
 0x33c   : > { %2883 = vmatmul.mubr.msk.f32.vlgmr.msra.gmra.mrb[8].mxu0 %vm1047_vm6, %v396_v58 }
 0x33d   : > { %2812 = vmatpush1.msk.msra.mxu0 %vm438_vm0, %v1319_v27  ;;  %1396 = vmatprep.mubr.f32.mxu0 %v3630_v0 }
 0x33e   : > { %3238 = vrot.lane.b32.xlu0 %v3232_v25, %s4650_s21  ;;  %2817 = vmatprep.subr.msk.mxu0 %vm438_vm0, %v3865_v3  ;;  %v1531_v3 = vpop.permute.xlu1 %1530 }
 0x33f   : > { %v1534_v34 = vsel %vm906_vm4, %v1531_v3, %v1533_v32 }
 0x340   : > { %2813 = vmatmul.mubr.msk.f32.vlgmr.msra.gmra.mrb[10].mxu0 %vm429_vm2, %v1306_v30 }
 0x341   : > { %1402 = vmatprep.mubr.f32.mxu0 %v3630_v0  ;;  %2818 = vmatpush1.msk.msra.mxu0 %vm438_vm0, %v3856_v1 }
 0x342   : > { %2823 = vmatprep.subr.msk.mxu0 %vm438_vm0, %v1533_v32  ;;  %v1523_v1 = vpop.permute.xlu1 %1522 }
 0x344   : > { %2814 = vmatmul.mubr.msk.f32.gmra.mrb[12].mxu0 %vm429_vm2, %v1308_v21 }
 0x345   : > { %1408 = vmatprep.mubr.f32.mxu0 %v3630_v0 }
 0x348   : > { %2815 = vmatmul.mubr.msk.f32.gmra.mrb[14].mxu0 %vm429_vm2, %v1310_v33 }
 0x349   : > { %1414 = vmatprep.mubr.f32.mxu0 %v3630_v0 }
 0x34c   : > { %2816 = vmatmul.mubr.msk.f32.gmra.mrb[16].mxu0 %vm429_vm2, %v1312_v29 }
 0x34d   : > { %1497 = vmatprep.mubr.f32.mxu0 %v3630_v0 }
 0x350   : > { %2819 = vmatmul.mubr.msk.f32.vlgmr.msra.gmra.mrb[10].mxu0 %vm429_vm2, %v4001_v6  ;;  %v1525_v6 = vpop.permute.xlu0 %1524 }
 0x351   : > { %1503 = vmatprep.mubr.f32.mxu0 %v3630_v0  ;;  %2824 = vmatpush1.msk.msra.mxu0 %vm438_vm0, %v1534_v34 }
 0x354   : > { %2820 = vmatmul.mubr.msk.f32.gmra.mrb[12].mxu0 %vm429_vm2, %v4010_v7  ;;  %v1527_v7 = vpop.permute.xlu1 %1526 }
 0x355   : > { %1509 = vmatprep.mubr.f32.mxu0 %v3630_v0 }
 0x358   : > { %2821 = vmatmul.mubr.msk.f32.gmra.mrb[14].mxu0 %vm429_vm2, %v4015_v8  ;;  %v1529_v8 = vpop.permute.xlu0 %1528 }
 0x359   : > { %1515 = vmatprep.mubr.f32.mxu0 %v3630_v0 }
 0x35c   : > { %2822 = vmatmul.mubr.msk.f32.gmra.mrb[16].mxu0 %vm429_vm2, %v4024_v9  ;;  %v1647_v9 = vpop.permute.xlu1 %1646  ;;  %v1652_v35 = vpop.permute.xlu0 %1651 }
 0x35d   : > { %1611 = vmatprep.mubr.f32.mxu0 %v3630_v0 }
 0x360   : > { %2825 = vmatmul.mubr.msk.f32.vlgmr.msra.gmra.mrb[10].mxu0 %vm429_vm2, %v1523_v1  ;;  %v1657_v36 = vpop.permute.xlu1 %1656  ;;  %v4142_v37 = vpop.permute.xlu0 %1661 }
 0x361   : > { %1617 = vmatprep.mubr.f32.mxu0 %v3630_v0 }
 0x364   : > { %2826 = vmatmul.mubr.msk.f32.gmra.mrb[12].mxu0 %vm429_vm2, %v1525_v6  ;;  %v1030_v39 = vpop.permute.xlu1 %1029  ;;  %v1193_v40 = vpop.permute.xlu0 %1192 }
 0x365   : > { %1623 = vmatprep.mubr.f32.mxu0 %v3630_v0 }
 0x368   : > { %2827 = vmatmul.mubr.msk.f32.gmra.mrb[14].mxu0 %vm429_vm2, %v1527_v7 }
 0x369   : > { %1629 = vmatprep.mubr.f32.mxu0 %v3630_v0 }
 0x36c   : > { %2828 = vmatmul.mubr.msk.f32.gmra.mrb[16].mxu0 %vm429_vm2, %v1529_v8 }
 0x3a8   : > { %v3224_v42 = vpop.permute.xlu1 %3223 }
 0x3a9   : > { %v3226_v43 = vunpack.i.h.bf16 %v3224_v42  ;;  %v3225_v45 = vunpack.i.l.bf16 %v3224_v42  ;;  %v1297_v42 = vld [vmem:[%s4648_s2 + $0x58] sm:$0xff] }
 0x3ab   : > { %v1043_v48 = vsel %vm427_vm1, %v3225_v45, %v3226_v43  ;;  %v1298_v43 = vld [vmem:[%s4648_s2 + $0x60] sm:$0xff] }
 0x3ac   : > { %v3229_v46 = vpop.permute.xlu1 %3228  ;;  %v3234_v31 = vpop.permute.xlu0 %3233 }
 0x3ad   : > { %v3236_v41 = vunpack.i.h.bf16 %v3234_v31  ;;  %v3235_v47 = vunpack.i.l.bf16 %v3234_v31  ;;  %v3231_v50 = vunpack.i.h.bf16 %v3229_v46  ;;  %v3230_v51 = vunpack.i.l.bf16 %v3229_v46 }
 0x3af   : > { %v1044_v28 = vsel %vm427_vm1, %v3235_v47, %v3236_v41  ;;  %v1202_v54 = vsel %vm906_vm4, %v3230_v51, %v3231_v50 }
 0x3b0   : > { %v2938_v38 = vpack.c.bf16 %v1044_v28, %v1043_v48  ;;  %v3239_v44 = vpop.permute.xlu0 %3238 }
 0x3b1   : > { %v3241_v52 = vunpack.i.h.bf16 %v3239_v44  ;;  %v3240_v53 = vunpack.i.l.bf16 %v3239_v44 }
 0x3b2   : > { %2939 = vmatpush3.bf16.msra.mxu1 %v2938_v38 }
 0x3b3   : > { %v1203_v49 = vsel %vm906_vm4, %v3240_v53, %v3241_v52  ;;  %2943 = vmatprep.subr.bf16.mxu1 %v3639_v59 }
 0x3b4   : > { %v2944_v55 = vpack.c.bf16 %v1203_v49, %v1202_v54 }
 0x3b5   : > { %2876 = vmatmul.mubr.msk.f32.vlgmr.msra.gmra.mrb[4].mxu1 %vm1047_vm6, %v1030_v39 }
 0x3b6   : > { %2945 = vmatpush3.bf16.msra.mxu1 %v2944_v55  ;;  %2889 = vmatprep.mubr.msk.f32.mxu1 %vm3640_vm5, %v3630_v0 }
 0x3b9   : > { %2890 = vmatmul.mubr.msk.f32.vlgmr.msra.gmra.mrb[6].mxu1 %vm1047_vm6, %v1193_v40  ;;  %v4216_v40 = vld [vmem:[%s4647_s1 + $0x60] sm:$0xff] }
 0x3ba   : > { %1802 = vmatprep.mubr.f32.mxu1 %v3630_v0 }
 0x40f   : > { %v4154_v56 = vpop.f32.mrb[8].mxu0 }
 0x410   : > { %v2884_v57 = vpop.f32.mrb[9].mxu0 }
 0x433   : > { %v1613_v58 = vpop.f32.mrb[10].mxu0 }
 0x434   : > { %v1664_v60 = vadd.f32 %v1647_v9, %v1613_v58  ;;  %v1615_v61 = vpop.f32.mrb[11].mxu0 }
 0x435   : > { %v1665_v62 = vadd.f32 %v1647_v9, %v1615_v61 }
 0x436   : > { %v1672_v63 = vmul.f32 0.1, %v1664_v60 }
 0x437   : > { %v1673_v2 = vmul.f32 0.1, %v1665_v62  ;;  %v1619_v4 = vpop.f32.mrb[12].mxu0 }
 0x438   : > { %v4156_v5 = vmax.f32 %v1664_v60, %v1672_v63  ;;  %v1666_v10 = vadd.f32 %v1652_v35, %v1619_v4  ;;  %v1621_v11 = vpop.f32.mrb[13].mxu0 }
 0x439   : > { %v4158_v12 = vmax.f32 %v1665_v62, %v1673_v2  ;;  %v1667_v13 = vadd.f32 %v1652_v35, %v1621_v11  ;;  %v4202_v35 = vld [vmem:[%s4647_s1 + $0x58] sm:$0xff] }
 0x43a   : > { %1688 = vst [vmem:[%s4162_s26] sm:$0xff] %v4156_v5  ;;  %v1674_v14 = vmul.f32 0.1, %v1666_v10 }
 0x43b   : > { %v1675_v15 = vmul.f32 0.1, %v1667_v13  ;;  %v1625_v16 = vpop.f32.mrb[14].mxu0  ;;  %v3242_v17 = vpack.i.bf16 %v4158_v12, %v4156_v5 }
 0x43c   : > { %v4168_v18 = vmax.f32 %v1666_v10, %v1674_v14  ;;  %v1668_v19 = vadd.f32 %v1657_v36, %v1625_v16  ;;  %v1627_v20 = vpop.f32.mrb[15].mxu0 }
 0x43d   : > { %v4170_v21 = vmax.f32 %v1667_v13, %v1675_v15  ;;  %v1669_v22 = vadd.f32 %v1657_v36, %v1627_v20  ;;  %3243 = vrot.lane.b32.xlu0 %v3242_v17, %s4610_s14 }
 0x43e   : > { %1689 = vst [vmem:[%s4162_s26 + $0x8] sm:$0xff] %v4168_v18  ;;  %v1676_v23 = vmul.f32 0.1, %v1668_v19  ;;  %v2956_v24 = vpack.c.bf16 %v4168_v18, %v4156_v5 }
 0x43f   : > { %v1677_v25 = vmul.f32 0.1, %v1669_v22  ;;  %v1631_v26 = vpop.f32.mrb[16].mxu0  ;;  %v3247_v27 = vpack.i.bf16 %v4170_v21, %v4168_v18  ;;  %v2954_v33 = vpack.c.bf16 %v4170_v21, %v4158_v12 }
 0x440   : > { %v4179_v29 = vmax.f32 %v1668_v19, %v1676_v23  ;;  %v1670_v30 = vadd.f32 %v4142_v37, %v1631_v26  ;;  %v1633_v32 = vpop.f32.mrb[17].mxu0 }
 0x441   : > { %v4184_v3 = vmax.f32 %v1669_v22, %v1677_v25  ;;  %v1671_v34 = vadd.f32 %v4142_v37, %v1633_v32  ;;  %3248 = vrot.lane.b32.xlu1 %v3247_v27, %s4610_s14 }
 0x442   : > { %1690 = vst [vmem:[%s4162_s26 + $0x10] sm:$0xff] %v4179_v29  ;;  %v1678_v1 = vmul.f32 0.1, %v1670_v30 }
 0x443   : > { %v1679_v6 = vmul.f32 0.1, %v1671_v34  ;;  %v3252_v7 = vpack.i.bf16 %v4184_v3, %v4179_v29 }
 0x444   : > { %v4192_v8 = vmax.f32 %v1670_v30, %v1678_v1 }
 0x445   : > { %v4194_v9 = vmax.f32 %v1671_v34, %v1679_v6  ;;  %3253 = vrot.lane.b32.xlu1 %v3252_v7, %s4610_s14 }
 0x446   : > { %1691 = vst [vmem:[%s4162_s26 + $0x18] sm:$0xff] %v4192_v8  ;;  %v2960_v36 = vpack.c.bf16 %v4192_v8, %v4179_v29 }
 0x447   : > { %v3257_v37 = vpack.i.bf16 %v4194_v9, %v4192_v8  ;;  %v2958_v39 = vpack.c.bf16 %v4194_v9, %v4184_v3 }
 0x449   : > { %1694 = vrot.lane.b32.xlu1 %v4202_v35, %s4649_s5  ;;  %3258 = vrot.lane.b32.xlu0 %v3257_v37, %s4610_s14  ;;  %s4285_s14 = scalar_lea.vmem [#allocation11], %s4653_s0  ;;  %s4333_s0 = sshll.u32 %s368_s17, 4  ;;  %s4457_s0 = int_to_ptr.vmem [resolvable:$true] %s4333_s0 }
 0x44d   : > { %3263 = vrot.lane.b32.xlu1 %v3242_v17, %s4650_s21  ;;  %1696 = vrot.lane.b32.xlu0 %v4216_v40, %s4649_s5 }
 0x451   : > { %3273 = vrot.lane.b32.xlu1 %v3252_v7, %s4650_s21  ;;  %3268 = vrot.lane.b32.xlu0 %v3247_v27, %s4650_s21 }
 0x455   : > { %3278 = vrot.lane.b32.xlu1 %v3242_v17, %s3641_s20  ;;  %3283 = vrot.lane.b32.xlu0 %v3257_v37, %s4650_s21 }
 0x459   : > { %1896 = vrot.lane.b32.xlu1 %v4202_v35, %s4652_s22  ;;  %3288 = vrot.lane.b32.xlu0 %v3247_v27, %s3641_s20 }
 0x45d   : > { %3298 = vrot.lane.b32.xlu1 %v3257_v37, %s3641_s20  ;;  %3293 = vrot.lane.b32.xlu0 %v3252_v7, %s3641_s20 }
 0x461   : > { %2013 = vrot.lane.b32.xlu1 %v4202_v35, %s3642_s23  ;;  %1898 = vrot.lane.b32.xlu0 %v4216_v40, %s4652_s22  ;;  %s2516_s22 = sshll.u32 %s4285_s14, 4  ;;  %s4330_s22 = int_to_ptr.vmem [resolvable:$true] %s2516_s22 }
 0x465   : > { %2133 = vperm.xlu1 %3181, %v1297_v42   ;;  %2015 = vrot.lane.b32.xlu0 %v4216_v40, %s3642_s23  ;;  %s4655_s23 = smov 112  }
 0x469   : > { %2138 = vperm.xlu0 %3180, %v1298_v43  }
 0x488   : > { %v1116_v45 = vpop.f32.mrb[4].mxu1 }
 0x489   : > { %v1189_v46 = vadd.f32 %v4154_v56, %v1116_v45  ;;  %v2877_v31 = vpop.f32.mrb[5].mxu1 }
 0x48c   : > { %v1274_v41 = vpop.f32.mrb[6].mxu1 }
 0x48d   : > { %v4237_v47 = vadd.f32 %v1274_v41, %v1189_v46  ;;  %v2891_v48 = vpop.f32.mrb[7].mxu1 }
 0x4af   : > { %v3244_v50 = vpop.permute.xlu0 %3243 }
 0x4b0   : > { %v3246_v51 = vunpack.i.h.bf16 %v3244_v50  ;;  %v3245_v28 = vunpack.i.l.bf16 %v3244_v50 }
 0x4b2   : > { %v1722_v53 = vsel %vm427_vm1, %v3245_v28, %v3246_v51 }
 0x4b3   : > { %v3249_v38 = vpop.permute.xlu1 %3248 }
 0x4b4   : > { %v3251_v44 = vunpack.i.h.bf16 %v3249_v38  ;;  %v3250_v52 = vunpack.i.l.bf16 %v3249_v38 }
 0x4b6   : > { %v1723_v54 = vsel %vm427_vm1, %v3250_v52, %v3251_v44  ;;  %v2946_v49 = vpack.c.bf16 %v3251_v44, %v3246_v51 }
 0x4b7   : > { %v2948_v55 = vpack.c.bf16 %v1723_v54, %v1722_v53  ;;  %v3254_v57 = vpop.permute.xlu1 %3253 }
 0x4b8   : > { %2947 = vmatprep.subr.bf16.mxu1 %v2946_v49  ;;  %v3256_v56 = vunpack.i.h.bf16 %v3254_v57  ;;  %v3255_v58 = vunpack.i.l.bf16 %v3254_v57 }
 0x4b9   : > { %2949 = vmatpush1.bf16.msra.mxu1 %v2948_v55 }
 0x4ba   : > { %v1724_v2 = vsel %vm427_vm1, %v3255_v58, %v3256_v56 }
 0x4bb   : > { %v1695_v60 = vpop.permute.xlu1 %1694  ;;  %v3259_v61 = vpop.permute.xlu0 %3258 }
 0x4bc   : > { %v3261_v62 = vunpack.i.h.bf16 %v3259_v61  ;;  %v3260_v63 = vunpack.i.l.bf16 %v3259_v61 }
 0x4be   : > { %v2950_v4 = vpack.c.bf16 %v3261_v62, %v3256_v56  ;;  %v1725_v10 = vsel %vm427_vm1, %v3260_v63, %v3261_v62 }
 0x4bf   : > { %v2952_v11 = vpack.c.bf16 %v1725_v10, %v1724_v2  ;;  %v3264_v13 = vpop.permute.xlu1 %3263  ;;  %v1697_v14 = vpop.permute.xlu0 %1696 }
 0x4c0   : > { %2951 = vmatprep.subr.bf16.mxu1 %v2950_v4  ;;  %v3266_v20 = vunpack.i.h.bf16 %v3264_v13  ;;  %v3265_v22 = vunpack.i.l.bf16 %v3264_v13 }
 0x4c1   : > { %2953 = vmatpush1.bf16.msra.mxu1 %v2952_v11 }
 0x4c2   : > { %2955 = vmatprep.subr.bf16.mxu1 %v2954_v33  ;;  %v1916_v5 = vsel %vm906_vm4, %v3265_v22, %v3266_v20  ;;  %v1299_v22 = vld [vmem:[%s4648_s2 + $0x68] sm:$0xff] }
 0x4c3   : > { %v3274_v15 = vpop.permute.xlu1 %3273  ;;  %v3269_v16 = vpop.permute.xlu0 %3268 }
 0x4c4   : > { %v3271_v17 = vunpack.i.h.bf16 %v3269_v16  ;;  %v3270_v19 = vunpack.i.l.bf16 %v3269_v16  ;;  %2829 = vmatmul.mubr.msk.f32.vlgmr.msra.gmra.mrb[8].mxu1 %vm723_vm3, %v1695_v60  ;;  %v3276_v18 = vunpack.i.h.bf16 %v3274_v15  ;;  %v1292_v16 = vld [vmem:[%s4647_s1 + $0x68] sm:$0xff] }
 0x4c5   : > { %2957 = vmatpush1.bf16.msra.mxu1 %v2956_v24  ;;  %1808 = vmatprep.mubr.f32.mxu1 %v3630_v0  ;;  %v3275_v24 = vunpack.i.l.bf16 %v3274_v15 }
 0x4c6   : > { %2959 = vmatprep.subr.bf16.mxu1 %v2958_v39  ;;  %v2962_v23 = vpack.c.bf16 %v3271_v17, %v3266_v20  ;;  %v1917_v25 = vsel %vm906_vm4, %v3270_v19, %v3271_v17  ;;  %v403_v20 = vld [vmem:[%s4648_s2 + $0x30] sm:$0xff] }
 0x4c7   : > { %v3279_v12 = vpop.permute.xlu1 %3278  ;;  %v3284_v21 = vpop.permute.xlu0 %3283  ;;  %v2964_v30 = vpack.c.bf16 %v1917_v25, %v1916_v5  ;;  %v1918_v7 = vsel %vm906_vm4, %v3275_v24, %v3276_v18 }
 0x4c8   : > { %v3286_v26 = vunpack.i.h.bf16 %v3284_v21  ;;  %v3285_v27 = vunpack.i.l.bf16 %v3284_v21  ;;  %2830 = vmatmul.mubr.msk.f32.gmra.mrb[10].mxu1 %vm723_vm3, %v1697_v14  ;;  %v3281_v29 = vunpack.i.h.bf16 %v3279_v12  ;;  %v3280_v8 = vunpack.i.l.bf16 %v3279_v12 }
 0x4c9   : > { %2961 = vmatpush1.bf16.msra.mxu1 %v2960_v36  ;;  %1883 = vmatprep.mubr.f32.mxu1 %v3630_v0 }
 0x4ca   : > { %2963 = vmatprep.subr.bf16.mxu1 %v2962_v23  ;;  %v2966_v3 = vpack.c.bf16 %v3286_v26, %v3276_v18  ;;  %v1919_v34 = vsel %vm906_vm4, %v3285_v27, %v3286_v26 }
 0x4cb   : > { %v1897_v32 = vpop.permute.xlu1 %1896  ;;  %v3289_v33 = vpop.permute.xlu0 %3288  ;;  %v2968_v9 = vpack.c.bf16 %v1919_v34, %v1918_v7 }
 0x4cc   : > { %v3291_v1 = vunpack.i.h.bf16 %v3289_v33  ;;  %v3290_v6 = vunpack.i.l.bf16 %v3289_v33  ;;  %2831 = vmatmul.mubr.msk.f32.vlgmr.msra.gmra.mrb[8].mxu1 %vm723_vm3, %v4202_v35  ;;  %v2034_v35 = vsel %vm2033_vm7, %v3280_v8, %v3281_v29 }
 0x4cd   : > { %2965 = vmatpush1.bf16.msra.mxu1 %v2964_v30  ;;  %1889 = vmatprep.mubr.f32.mxu1 %v3630_v0 }
 0x4ce   : > { %2967 = vmatprep.subr.bf16.mxu1 %v2966_v3  ;;  %v2970_v36 = vpack.c.bf16 %v3291_v1, %v3281_v29  ;;  %v2035_v37 = vsel %vm2033_vm7, %v3290_v6, %v3291_v1 }
 0x4cf   : > { %v3299_v39 = vpop.permute.xlu1 %3298  ;;  %v3294_v42 = vpop.permute.xlu0 %3293  ;;  %v2972_v41 = vpack.c.bf16 %v2035_v37, %v2034_v35 }
 0x4d0   : > { %v3301_v43 = vunpack.i.h.bf16 %v3299_v39  ;;  %v3300_v45 = vunpack.i.l.bf16 %v3299_v39  ;;  %v3296_v46 = vunpack.i.h.bf16 %v3294_v42  ;;  %v3295_v31 = vunpack.i.l.bf16 %v3294_v42  ;;  %2832 = vmatmul.mubr.msk.f32.gmra.mrb[10].mxu1 %vm723_vm3, %v4216_v40 }
 0x4d1   : > { %2969 = vmatpush1.bf16.msra.mxu1 %v2968_v9  ;;  %1996 = vmatprep.mubr.f32.mxu1 %v3630_v0 }
 0x4d2   : > { %2971 = vmatprep.subr.bf16.mxu1 %v2970_v36  ;;  %v2037_v48 = vsel %vm2033_vm7, %v3300_v45, %v3301_v43  ;;  %v2974_v50 = vpack.c.bf16 %v3301_v43, %v3296_v46  ;;  %v2036_v51 = vsel %vm2033_vm7, %v3295_v31, %v3296_v46 }
 0x4d3   : > { %v1899_v28 = vpop.permute.xlu0 %1898  ;;  %v2976_v40 = vpack.c.bf16 %v2037_v48, %v2036_v51  ;;  %v2014_v38 = vpop.permute.xlu1 %2013 }
 0x4d4   : > { %2833 = vmatmul.mubr.msk.f32.vlgmr.msra.gmra.mrb[8].mxu1 %vm723_vm3, %v1897_v32 }
 0x4d5   : > { %2973 = vmatpush1.bf16.msra.mxu1 %v2972_v41  ;;  %2002 = vmatprep.mubr.f32.mxu1 %v3630_v0 }
 0x4d6   : > { %2975 = vmatprep.subr.bf16.mxu1 %v2974_v50 }
 0x4d7   : > { %v2016_v44 = vpop.permute.xlu0 %2015 }
 0x4d8   : > { %2834 = vmatmul.mubr.msk.f32.gmra.mrb[10].mxu1 %vm723_vm3, %v1899_v28 }
 0x4d9   : > { %2977 = vmatpush1.bf16.msra.mxu1 %v2976_v40  ;;  %2114 = vmatprep.mubr.f32.mxu1 %v3630_v0 }
 0x4da   : > { %2978 = vmatprep.subr.bf16.mxu1 %v3639_v59 }
 0x4dc   : > { %2835 = vmatmul.mubr.msk.f32.vlgmr.msra.gmra.mrb[8].mxu1 %vm723_vm3, %v2014_v38 }
 0x4dd   : > { %2120 = vmatprep.mubr.f32.mxu1 %v3630_v0 }
 0x4e0   : > { %2836 = vmatmul.mubr.msk.f32.gmra.mrb[10].mxu1 %vm723_vm3, %v2016_v44 }
 0x4e1   : > { %2896 = vmatprep.mubr.msk.f32.mxu1 %vm3640_vm5, %v3630_v0 }
 0x4e4   : > { %v2134_v52 = vpop.permute.xlu1 %2133 }
 0x4e8   : > { %v2139_v56 = vpop.permute.xlu0 %2138 }
 0x5af   : > { %v2116_v53 = vpop.f32.mrb[8].mxu1 }
 0x5b0   : > { %v2141_v54 = vadd.f32 %v2134_v52, %v2116_v53  ;;  %v2118_v49 = vpop.f32.mrb[9].mxu1 }
 0x5b1   : > { %v2142_v55 = vadd.f32 %v2134_v52, %v2118_v49 }
 0x5b2   : > { %v2145_v57 = vmul.f32 0.1, %v2141_v54 }
 0x5b3   : > { %v2146_v58 = vmul.f32 0.1, %v2142_v55  ;;  %v2122_v60 = vpop.f32.mrb[10].mxu1 }
 0x5b4   : > { %v2149_v61 = vmax.f32 %v2141_v54, %v2145_v57  ;;  %v2143_v62 = vadd.f32 %v2139_v56, %v2122_v60  ;;  %v2124_v63 = vpop.f32.mrb[11].mxu1 }
 0x5b5   : > { %v2150_v2 = vmax.f32 %v2142_v55, %v2146_v58  ;;  %v2144_v4 = vadd.f32 %v2139_v56, %v2124_v63 }
 0x5b6   : > { %2153 = vst [vmem:[%s4285_s14] sm:$0xff] %v2149_v61  ;;  %v2147_v10 = vmul.f32 0.1, %v2143_v62 }
 0x5b7   : > { %v2148_v11 = vmul.f32 0.1, %v2144_v4  ;;  %v3302_v13 = vpack.i.bf16 %v2150_v2, %v2149_v61 }
 0x5b8   : > { %v2151_v14 = vmax.f32 %v2143_v62, %v2147_v10 }
 0x5b9   : > { %v2152_v15 = vmax.f32 %v2144_v4, %v2148_v11  ;;  %3303 = vrot.lane.b32.xlu1 %v3302_v13, %s4654_s8 }
 0x5ba   : > { %2154 = vst [vmem:[%s4285_s14 + $0x8] sm:$0xff] %v2151_v14  ;;  %v2982_v17 = vpack.c.bf16 %v2151_v14, %v2149_v61 }
 0x5bb   : > { %v3307_v19 = vpack.i.bf16 %v2152_v15, %v2151_v14 }
 0x5bd   : > { %2156 = vrot.lane.b32.xlu1 %v1292_v16, %s4655_s23  ;;  %3308 = vrot.lane.b32.xlu0 %v3307_v19, %s4654_s8  ;;  %s2467_s8 = sshll.u32 %s4095_s24, 4  ;;  %s3032_s23 = smul.u32 6, %s3615_s12  ;;  %s4327_s8 = int_to_ptr.vmem [resolvable:$true] %s2467_s8 }
 0x5be   : > { %s4340_s24 = sadd.s32 %s3611_s11, %s3031_s25  ;;  %s3353_s9 = scalar_lea.vmem %s4327_s8, 256 }
 0x5bf   : > { %s2844_s20 = sshll.u32 %s4340_s24, 7  ;;  %p3354_p7 = scmp.ne.s32.totalorder %s4327_s8, %s3353_s9 }
 0x5c1   : > { %3318 = vrot.lane.b32.xlu1 %v3307_v19, %s4650_s21  ;;  %3313 = vrot.lane.b32.xlu0 %v3302_v13, %s4650_s21  ;;  %s2499_s21 = sshll.u32 %s4162_s26, 4  ;;  %s4337_s26 = sadd.s32 %s3611_s11, %s3032_s23  ;;  %s4325_s21 = int_to_ptr.vmem [resolvable:$true] %s2499_s21 }
 0x5c2   : > { %s4615_s14 = sshll.u32 %s4337_s26, 7  ;;  %p3355_p2 = pnand %p3354_p7, %p4657_p12 }
 0x5c3   : > { %s4349_s10 = scalar_lea.hbm %s4656_s4, %s4615_s14  ;;  %s3643_s23 = smov [#allocation6]  }
 0x5c4   : > { %p3356_p4 = pneg %p3355_p2  ;;  %s3357_s25 = sshll.u32 %s3643_s23, 4  ;;  %s3358_s25 = int_to_ptr.vmem [resolvable:$false] %s3357_s25 }
 0x5c5   : > { %1281 = vperm.xlu1 %3181, %v403_v20   ;;  %2318 = vrot.lane.b32.xlu0 %v1292_v16, %s4649_s5  ;;  %s2450_s5 = sshll.u32 %s3926_s7, 4  ;;  %s4616_s7 = sand.u32 1, %s3751_s16   ;;  %s4323_s5 = int_to_ptr.vmem [resolvable:$true] %s2450_s5 }
 0x5c6   : > { %s3359_s18 = scalar_lea.vmem %s3358_s25, 512  ;;  %p3360_p11 = scmp.lt.s32.totalorder %s4327_s8, %s3358_s25 }
 0x5c7   : > { %p3361_p1 = scmp.lt.s32.totalorder %s3359_s18, %s3353_s9 }
 0x5c9   : > { %2407 = vperm.xlu0 %3180, %v1299_v22   ;;  %p3362_p8 = por %p3361_p1, %p3360_p11 }
 0x5cb   : > { %p3363_p10 = pnand %p3362_p8, %p3356_p4 }
 0x62b   : > { %v3304_v12 = vpop.permute.xlu1 %3303 }
 0x62c   : > { %v3306_v21 = vunpack.i.h.bf16 %v3304_v12  ;;  %v3305_v23 = vunpack.i.l.bf16 %v3304_v12 }
 0x62e   : > { %v2170_v18 = vsel %vm427_vm1, %v3305_v23, %v3306_v21 }
 0x62f   : > { %v2157_v25 = vpop.permute.xlu1 %2156  ;;  %v3309_v26 = vpop.permute.xlu0 %3308 }
 0x630   : > { %v3311_v27 = vunpack.i.h.bf16 %v3309_v26  ;;  %v3310_v5 = vunpack.i.l.bf16 %v3309_v26 }
 0x632   : > { %v2171_v24 = vsel %vm427_vm1, %v3310_v5, %v3311_v27 }
 0x633   : > { %v2979_v30 = vpack.c.bf16 %v2171_v24, %v2170_v18  ;;  %v3319_v32 = vpop.permute.xlu1 %3318  ;;  %v3314_v33 = vpop.permute.xlu0 %3313 }
 0x634   : > { %v3321_v3 = vunpack.i.h.bf16 %v3319_v32  ;;  %v3320_v34 = vunpack.i.l.bf16 %v3319_v32  ;;  %v3316_v1 = vunpack.i.h.bf16 %v3314_v33  ;;  %v3315_v6 = vunpack.i.l.bf16 %v3314_v33 }
 0x635   : > { %2980 = vmatpush3.bf16.msra.mxu1 %v2979_v30 }
 0x636   : > { %2981 = vmatprep.subr.bf16.mxu1 %v3639_v59  ;;  %v2329_v29 = vsel %vm906_vm4, %v3320_v34, %v3321_v3  ;;  %v2328_v7 = vsel %vm906_vm4, %v3315_v6, %v3316_v1 }
 0x637   : > { %v2985_v8 = vpack.c.bf16 %v2329_v29, %v2328_v7  ;;  %v2319_v9 = vpop.permute.xlu0 %2318 }
 0x638   : > { %2897 = vmatmul.mubr.msk.f32.vlgmr.msra.gmra.mrb[12].mxu1 %vm1047_vm6, %v2157_v25 }
 0x639   : > { %2983 = vmatpush3.bf16.msra.mxu1 %v2982_v17  ;;  %2903 = vmatprep.mubr.msk.f32.mxu1 %vm3640_vm5, %v3630_v0 }
 0x63a   : > { %2984 = vmatprep.subr.bf16.mxu1 %v3639_v59 }
 0x63c   : > { %2904 = vmatmul.mubr.msk.f32.vlgmr.msra.gmra.mrb[14].mxu1 %vm1047_vm6, %v1292_v16 }
 0x63d   : > { %2986 = vmatpush3.bf16.msra.mxu1 %v2985_v8  ;;  %2910 = vmatprep.mubr.msk.f32.mxu1 %vm3640_vm5, %v3630_v0 }
 0x640   : > { %2911 = vmatmul.mubr.msk.f32.vlgmr.msra.gmra.mrb[16].mxu1 %vm1047_vm6, %v2319_v9 }
 0x644   : > { %v1282_v36 = vpop.permute.xlu1 %1281 }
 0x645   : > { %v1284_v37 = vadd.f32 %v1282_v36, %v4237_v47 }
 0x647   : > { %1285 = vst [vmem:[%s368_s17] sm:$0x1] %v1284_v37  ;;  %s4353_s17 = scalar_lea.sflag [#allocation7], %s4616_s7 }
 0x648   : > { %3366 = shalt.err (!%p3363_p10)
}
 0x649   : > { %s3367_s1 = scalar_lea.hbm %s4349_s10, 256  ;;  %s3371_s23 = scalar_lea.hbm %s4656_s4, 1536 }
 0x64a   : > { %p3368_p3 = scmp.ne.s32.totalorder %s4349_s10, %s3367_s1  ;;  %p3372_p5 = scmp.lt.u32.totalorder %s4349_s10, %s4656_s4 }
 0x64b   : > { %p3373_p6 = scmp.lt.u32.totalorder %s3371_s23, %s3367_s1  ;;  %p3375_p7 = scmp.lt.u32.totalorder %s3367_s1, %s4349_s10 }
 0x64c   : > { %p3369_p13 = pnand %p3368_p3, %p4657_p12 }
 0x64d   : > { %p3374_p9 = por %p3373_p6, %p3372_p5 }
 0x64e   : > { %p3370_p0 = pneg %p3369_p13 }
 0x64f   : > { %p3376_p2 = por %p3375_p7, %p3374_p9 }
 0x651   : > { %p3377_p4 = pnand %p3376_p2, %p3370_p0 }
 0x653   : > { %3380 = shalt.err (!%p3377_p4)
}
 0x654   : > { %s3644_s9 = smov 128   ;;  %s3645_s18 = smov 384  }
 0x655   : > { %s3646_s7 = smov 8   ;;  %s4385_s2 = scalar_lea.hbm %s4591_s6, %s2844_s20 }
 0x656   : > { %3040 = dma.vmem_to_hbm [thread:$0]  (%p4657_p12), %s4327_s8, 256, %s4349_s10, %s4353_s17, %s3644_s9, %s3645_s18, %s3646_s7  }
 0x657   : > { %s4658_s23 = sand.u32 1, %s3751_s16   ;;  %s3381_s4 = scalar_lea.vmem %s4325_s21, 512 }
 0x658   : > { %s4389_s25 = scalar_lea.sflag [#allocation10], %s4658_s23  ;;  %p3382_p11 = scmp.ne.s32.totalorder %s4325_s21, %s3381_s4 }
 0x659   : > { %s3647_s29 = smov [#allocation9]  }
 0x65a   : > { %p3383_p1 = pnand %p3382_p11, %p4657_p12  ;;  %s3385_s28 = sshll.u32 %s3647_s29, 4  ;;  %s3386_s28 = int_to_ptr.vmem [resolvable:$false] %s3385_s28 }
 0x65b   : > { %s3387_s19 = scalar_lea.vmem %s3386_s28, 1024  ;;  %p3388_p10 = scmp.lt.s32.totalorder %s4325_s21, %s3386_s28 }
 0x65c   : > { %p3384_p8 = pneg %p3383_p1  ;;  %p3389_p3 = scmp.lt.s32.totalorder %s3387_s19, %s3381_s4 }
 0x65e   : > { %p3390_p13 = por %p3389_p3, %p3388_p10 }
 0x660   : > { %p3391_p0 = pnand %p3390_p13, %p3384_p8 }
 0x662   : > { %3394 = shalt.err (!%p3391_p0)
}
 0x663   : > { %s3395_s10 = scalar_lea.hbm %s4385_s2, 512  ;;  %s3399_s29 = scalar_lea.hbm %s4591_s6, 3072 }
 0x664   : > { %p3396_p5 = scmp.ne.s32.totalorder %s4385_s2, %s3395_s10  ;;  %p3400_p7 = scmp.lt.u32.totalorder %s4385_s2, %s4591_s6 }
 0x665   : > { %p3401_p2 = scmp.lt.u32.totalorder %s3399_s29, %s3395_s10  ;;  %p3403_p11 = scmp.lt.u32.totalorder %s3395_s10, %s4385_s2 }
 0x666   : > { %p3397_p6 = pnand %p3396_p5, %p4657_p12 }
 0x667   : > { %p3402_p4 = por %p3401_p2, %p3400_p7 }
 0x668   : > { %p3398_p9 = pneg %p3397_p6 }
 0x669   : > { %p3404_p1 = por %p3403_p11, %p3402_p4 }
 0x66b   : > { %p3405_p8 = pnand %p3404_p1, %p3398_p9 }
 0x66d   : > { %3408 = shalt.err (!%p3405_p8)
}
 0x66e   : > { %3042 = dma.vmem_to_hbm [thread:$0]  (%p4657_p12), %s4325_s21, 512, %s4385_s2, %s4389_s25, %s3644_s9, %s3645_s18, %s3646_s7  }
 0x66f   : > { %s4421_s1 = scalar_lea.hbm %s4588_s3, %s2844_s20  ;;  %s3033_s23 = smul.u32 3, %s3615_s12 }
 0x670   : > { %s2413_s10 = scalar_lea.sflag [#allocation4], %s3917_s13  ;;  %s3409_s16 = scalar_lea.vmem %s4323_s5, 512 }
 0x671   : > { %p3410_p10 = scmp.ne.s32.totalorder %s4323_s5, %s3409_s16  ;;  %s3648_s8 = smov [#allocation5]  }
 0x672   : > { %s3413_s29 = sshll.u32 %s3648_s8, 4  ;;  %s3414_s29 = int_to_ptr.vmem [resolvable:$false] %s3413_s29 }
 0x673   : > { %p3411_p3 = pnand %p3410_p10, %p4657_p12  ;;  %s3415_s14 = scalar_lea.vmem %s3414_s29, 1024 }
 0x674   : > { %p3416_p0 = scmp.lt.s32.totalorder %s4323_s5, %s3414_s29  ;;  %p3417_p5 = scmp.lt.s32.totalorder %s3415_s14, %s3409_s16 }
 0x675   : > { %p3412_p13 = pneg %p3411_p3 }
 0x676   : > { %p3418_p6 = por %p3417_p5, %p3416_p0 }
 0x678   : > { %p3419_p9 = pnand %p3418_p6, %p3412_p13 }
 0x67a   : > { %3422 = shalt.err (!%p3419_p9)
}
 0x67b   : > { %s3423_s21 = scalar_lea.hbm %s4421_s1, 512  ;;  %s3427_s2 = scalar_lea.hbm %s4588_s3, 3072 }
 0x67c   : > { %p3424_p7 = scmp.ne.s32.totalorder %s4421_s1, %s3423_s21  ;;  %p3428_p11 = scmp.lt.u32.totalorder %s4421_s1, %s4588_s3 }
 0x67d   : > { %p3429_p1 = scmp.lt.u32.totalorder %s3427_s2, %s3423_s21  ;;  %p3431_p10 = scmp.lt.u32.totalorder %s3423_s21, %s4421_s1 }
 0x67e   : > { %p3425_p2 = pnand %p3424_p7, %p4657_p12 }
 0x67f   : > { %p3430_p8 = por %p3429_p1, %p3428_p11 }
 0x680   : > { %p3426_p4 = pneg %p3425_p2 }
 0x681   : > { %p3432_p3 = por %p3431_p10, %p3430_p8 }
 0x683   : > { %p3433_p13 = pnand %p3432_p3, %p3426_p4 }
 0x685   : > { %3436 = shalt.err (!%p3433_p13)
}
 0x686   : > { %3039 = dma.vmem_to_hbm [thread:$0]  (%p4657_p12), %s4323_s5, 512, %s4421_s1, %s2413_s10, %s3644_s9, %s3645_s18, %s3646_s7  }
 0x687   : > { %s4454_s19 = sadd.s32 %s3611_s11, %s3033_s23  ;;  %s4659_s16 = sshll.u32 %s4337_s26, 7 }
 0x688   : > { %s4660_s14 = sld [smem:[#allocation35_spill]]  ;;  %s2846_s20 = sshll.u32 %s4454_s19, 4 }
 0x689   : > { %s4662_s12 = sld [smem:[#allocation34_spill]]  ;;  %s3437_s23 = scalar_lea.vmem %s4457_s0, 16 }
 0x68a   : > { %p3438_p0 = scmp.ne.s32.totalorder %s4457_s0, %s3437_s23  ;;  %s3649_s26 = smov [#allocation8]  }
 0x68b   : > { %s3441_s10 = sshll.u32 %s3649_s26, 4  ;;  %s3442_s10 = int_to_ptr.vmem [resolvable:$false] %s3441_s10 }
 0x68c   : > { %p3439_p5 = pnand %p3438_p0, %p4657_p12  ;;  %s3443_s28 = scalar_lea.vmem %s3442_s10, 32 }
 0x68d   : > { %p3444_p9 = scmp.lt.s32.totalorder %s4457_s0, %s3442_s10  ;;  %p3445_p7 = scmp.lt.s32.totalorder %s3443_s28, %s3437_s23 }
 0x68e   : > { %s4661_s21 = smov %s4660_s14  ;;  %s4464_s24 = scalar_lea.hbm %s4660_s14, %s4659_s16 }
 0x68f   : > { %s4663_s1 = smov %s4662_s12  ;;  %s2483_s11 = scalar_lea.hbm %s4662_s12, %s2846_s20 }
 0x690   : > { %p3440_p6 = pneg %p3439_p5  ;;  %p3446_p2 = por %p3445_p7, %p3444_p9 }
 0x692   : > { %p3447_p4 = pnand %p3446_p2, %p3440_p6 }
 0x694   : > { %3450 = shalt.err (!%p3447_p4)
}
 0x695   : > { %s3451_s4 = scalar_lea.hbm %s2483_s11, 16  ;;  %s3455_s29 = scalar_lea.hbm %s4663_s1, 96 }
 0x696   : > { %p3452_p11 = scmp.ne.s32.totalorder %s2483_s11, %s3451_s4  ;;  %p3456_p10 = scmp.lt.u32.totalorder %s2483_s11, %s4663_s1 }
 0x697   : > { %p3457_p3 = scmp.lt.u32.totalorder %s3455_s29, %s3451_s4  ;;  %p3459_p0 = scmp.lt.u32.totalorder %s3451_s4, %s2483_s11 }
 0x698   : > { %p3453_p1 = pnand %p3452_p11, %p4657_p12 }
 0x699   : > { %p3458_p13 = por %p3457_p3, %p3456_p10 }
 0x69a   : > { %p3454_p8 = pneg %p3453_p1 }
 0x69b   : > { %p3460_p5 = por %p3459_p0, %p3458_p13 }
 0x69d   : > { %p3461_p6 = pnand %p3460_p5, %p3454_p8 }
 0x69f   : > { %3464 = shalt.err (!%p3461_p6)
}
 0x6a0   : > { %3041 = dma.vmem_to_hbm [thread:$0]  (%p4657_p12), %s4457_s0, 16, %s2483_s11, %s4353_s17  }
 0x6a1   : > { %s3465_s5 = scalar_lea.vmem %s4330_s22, 256  ;;  %s3650_s12 = smov [#allocation11]  }
 0x6a2   : > { %p3466_p9 = scmp.ne.s32.totalorder %s4330_s22, %s3465_s5  ;;  %s3469_s23 = sshll.u32 %s3650_s12, 4  ;;  %s3470_s23 = int_to_ptr.vmem [resolvable:$false] %s3469_s23 }
 0x6a3   : > { %s3471_s26 = scalar_lea.vmem %s3470_s23, 512  ;;  %p3472_p4 = scmp.lt.s32.totalorder %s4330_s22, %s3470_s23 }
 0x6a4   : > { %p3467_p7 = pnand %p3466_p9, %p4657_p12  ;;  %p3473_p11 = scmp.lt.s32.totalorder %s3471_s26, %s3465_s5 }
 0x6a6   : > { %p3468_p2 = pneg %p3467_p7  ;;  %p3474_p1 = por %p3473_p11, %p3472_p4 }
 0x6a8   : > { %p3475_p8 = pnand %p3474_p1, %p3468_p2 }
 0x6aa   : > { %3478 = shalt.err (!%p3475_p8)
}
 0x6ab   : > { %s3479_s0 = scalar_lea.hbm %s4464_s24, 256  ;;  %s3483_s10 = scalar_lea.hbm %s4661_s21, 1536 }
 0x6ac   : > { %p3480_p10 = scmp.ne.s32.totalorder %s4464_s24, %s3479_s0  ;;  %p3484_p0 = scmp.lt.u32.totalorder %s4464_s24, %s4661_s21 }
 0x6ad   : > { %p3485_p5 = scmp.lt.u32.totalorder %s3483_s10, %s3479_s0  ;;  %p3487_p9 = scmp.lt.u32.totalorder %s3479_s0, %s4464_s24 }
 0x6ae   : > { %p3481_p3 = pnand %p3480_p10, %p4657_p12 }
 0x6af   : > { %p3486_p6 = por %p3485_p5, %p3484_p0 }
 0x6b0   : > { %p3482_p13 = pneg %p3481_p3 }
 0x6b1   : > { %p3488_p7 = por %p3487_p9, %p3486_p6 }
 0x6b3   : > { %p3489_p2 = pnand %p3488_p7, %p3482_p13 }
 0x6b5   : > { %3492 = shalt.err (!%p3489_p2)
}
 0x6b6   : > { %3043 = dma.vmem_to_hbm [thread:$0]  (%p4657_p12), %s4330_s22, 256, %s4464_s24, %s4389_s25, %s3644_s9, %s3645_s18, %s3646_s7   ;;  %v2408_v31 = vpop.permute.xlu0 %2407 }
 0x6b7   : > { %s388_s16 = scalar_lea.vmem [#allocation12], %s3917_s13  ;;  %s4664_s2 = sld [smem:[#allocation36_spill]] }
 0x6b8   : > { %s2534_s8 = sshll.u32 %s388_s16, 4  ;;  %s2437_s22 = scalar_lea.sflag [#allocation13], %s3917_s13  ;;  %s4522_s8 = int_to_ptr.vmem [resolvable:$true] %s2534_s8 }
 0x6b9   : > { %s3493_s9 = scalar_lea.vmem %s4522_s8, 16  ;;  %s3651_s18 = smov [#allocation12]  }
 0x6ba   : > { %p3494_p4 = scmp.ne.s32.totalorder %s4522_s8, %s3493_s9  ;;  %s3497_s7 = sshll.u32 %s3651_s18, 4  ;;  %s3498_s7 = int_to_ptr.vmem [resolvable:$false] %s3497_s7 }
 0x6bb   : > { %s3499_s25 = scalar_lea.vmem %s3498_s7, 32  ;;  %p3500_p8 = scmp.lt.s32.totalorder %s4522_s8, %s3498_s7 }
 0x6bc   : > { %p3495_p11 = pnand %p3494_p4, %p4657_p12  ;;  %p3501_p10 = scmp.lt.s32.totalorder %s3499_s25, %s3493_s9 }
 0x6bd   : > { %s4520_s5 = scalar_lea.hbm %s4664_s2, %s2846_s20 }
 0x6be   : > { %p3496_p1 = pneg %p3495_p11  ;;  %p3502_p3 = por %p3501_p10, %p3500_p8 }
 0x6c0   : > { %p3503_p13 = pnand %p3502_p3, %p3496_p1 }
 0x70b   : > { %v2242_v0 = vpop.f32.mrb[12].mxu1 }
 0x70c   : > { %v2898_v59 = vpop.f32.mrb[13].mxu1 }
 0x70f   : > { %v2314_v47 = vpop.f32.mrb[14].mxu1 }
 0x710   : > { %v2315_v39 = vadd.f32 %v2314_v47, %v2242_v0  ;;  %v2905_v42 = vpop.f32.mrb[15].mxu1 }
 0x713   : > { %v2400_v43 = vpop.f32.mrb[16].mxu1 }
 0x714   : > { %v2404_v45 = vadd.f32 %v2400_v43, %v2315_v39  ;;  %v2912_v46 = vpop.f32.mrb[17].mxu1 }
 0x716   : > { %v2410_v35 = vadd.f32 %v2408_v31, %v2404_v45 }
 0x718   : > { %2411 = vst [vmem:[%s388_s16] sm:$0x1] %v2410_v35 }
 0x719   : > { %3506 = shalt.err (!%p3503_p13)
}
 0x71a   : > { %s3507_s13 = scalar_lea.hbm %s4520_s5, 16  ;;  %s3511_s20 = scalar_lea.hbm %s4664_s2, 96 }
 0x71b   : > { %p3508_p0 = scmp.ne.s32.totalorder %s4520_s5, %s3507_s13  ;;  %p3512_p9 = scmp.lt.u32.totalorder %s4520_s5, %s4664_s2 }
 0x71c   : > { %p3513_p7 = scmp.lt.u32.totalorder %s3511_s20, %s3507_s13  ;;  %p3515_p4 = scmp.lt.u32.totalorder %s3507_s13, %s4520_s5 }
 0x71d   : > { %p3509_p5 = pnand %p3508_p0, %p4657_p12 }
 0x71e   : > { %p3514_p2 = por %p3513_p7, %p3512_p9 }
 0x71f   : > { %p3510_p6 = pneg %p3509_p5 }
 0x720   : > { %p3516_p11 = por %p3515_p4, %p3514_p2 }
 0x722   : > { %p3517_p1 = pnand %p3516_p11, %p3510_p6 }
 0x724   : > { %3520 = shalt.err (!%p3517_p1)
}
 0x725   : > { %3044 = dma.vmem_to_hbm [thread:$0]  (%p4657_p12), %s4522_s8, 16, %s4520_s5, %s2437_s22  }
 0x726 PF: > { %s4665_s26 = sld [smem:[#allocation29_spill]]  ;;  %p3075_p8 = scmp.ge.s32.totalorder %s3627_s15, 2 }
 0x727   : > { %s2546_s0 = sand.u32 1, %s3587_s27  }
 0x728   : > { %s2547_s17 = scalar_lea.sflag [#allocation4], %s2546_s0 }
 0x72c   : > { %p4666_p10 = scmp.ne.s32.totalorder %s4665_s26, 0 }
 0x72e   : > { %p3056_p3 = pnand %p3075_p8, %p4666_p10 }
 0x730   : > { %3570 = dma.done.wait (!%p3056_p3), %s2547_s17, 512  }
 0x731   : > { %3572 = vsyncadd (!%p3056_p3), %s2547_s17, 4294966784  ;;  %s4667_s11 = sadd.s32 4294967294, %s3627_s15  }
 0x732   : > { %s2555_s10 = sand.u32 1, %s4667_s11  }
 0x733   : > { %s2556_s28 = scalar_lea.sflag [#allocation7], %s2555_s10 }
 0x734   : > { %3574 = dma.done.wait (!%p3056_p3), %s2556_s28, 272  }
 0x735   : > { %3576 = vsyncadd (!%p3056_p3), %s2556_s28, 4294967024  ;;  %s2573_s30 = scalar_lea.sflag [#allocation10], %s2555_s10 }
 0x736   : > { %3578 = dma.done.wait (!%p3056_p3), %s2573_s30, 768  }
 0x737   : > { %3580 = vsyncadd (!%p3056_p3), %s2573_s30, 4294966528  ;;  %s2591_s4 = scalar_lea.sflag [#allocation13], %s2546_s0 }
 0x738   : > { %3582 = dma.done.wait (!%p3056_p3), %s2591_s4, 16  }
 0x739   : > { %3584 = vsyncadd (!%p3056_p3), %s2591_s4, 4294967280  ;;  %s34_s15 = sadd.s32 1, %s3627_s15   ;;  %s4668_s27 = sld [smem:[#allocation19_spill]] }
 0x73a   : > { %p31_p12 = scmp.ge.s32.totalorder %s34_s15, 8   ;;  %s4669_s28 = sld [smem:[#allocation20_spill]] }
 0x73b   : > { %s4670_s29 = sld [smem:[#allocation28_spill]]  ;;  %s4671_s30 = sld [smem:[#allocation21_spill]] }
 0x73c   : > { %s4672_s9 = sld [smem:[#allocation22_spill]]  ;;  %s4673_s10 = sld [smem:[#allocation27_spill]] }
 0x73d   : > { %s4674_s11 = sld [smem:[#allocation23_spill]]  ;;  %s4675_s12 = sld [smem:[#allocation24_spill]] }
 0x73e   : > { %s4676_s13 = sld [smem:[#allocation25_spill]]  ;;  %s4677_s14 = sld [smem:[#allocation26_spill]] }
 0x73f   :  { %33 = sbr.rel (!%p31_p12) target bundleno = 23 (0x17), region = 159 }
 0x746   :  { %2595 = vsyncpa [#allocation3], 1 }
 0x747   :  { %2597 = vsyncpa [#allocation3 + $0x1], 1 }
 0x748   :  { %2598 = vsyncpa [#allocation4], 1 }
 0x749   :  { %2600 = vsyncpa [#allocation4 + $0x1], 1 }
 0x74a   :  { %2601 = vsyncpa [#allocation7], 1 }
 0x74b   :  { %2603 = vsyncpa [#allocation7 + $0x1], 1 }
 0x74c   :  { %2604 = vsyncpa [#allocation10], 1 }
 0x74d   :  { %2606 = vsyncpa [#allocation10 + $0x1], 1 }
 0x74e   :  { %2607 = vsyncpa [#allocation13], 1 }
 0x74f   :  { %2609 = vsyncpa [#allocation13 + $0x1], 1 }

</bundles_post_ra>
